<compile_context>
chip_gen: v5e
topology: v5e:2x2
jax: 0.10.0
libtpu: 0.0.40
codegen_flags: <defaults>
</compile_context>

<pallas_src>
import functools

import jax
import jax.numpy as jnp
from jax.experimental import pallas as pl
from jax.experimental.pallas import tpu as pltpu


def _mha_kernel(x_ref, wqkv_ref, bqkv_ref, wproj_ref, bproj_ref, o_ref,
                *, num_heads, head_dim, scale):
    """One grid step handles TB batch elements.

    x_ref     : (TB, N, C)  VMEM bf16
    wqkv_ref  : (C, 3C)     VMEM bf16  (transposed: in_features x out_features)
    bqkv_ref  : (1, 3C)     VMEM fp32
    wproj_ref : (C, C)      VMEM bf16  (transposed)
    bproj_ref : (1, C)      VMEM fp32
    o_ref     : (TB, N, C)  VMEM (output dtype of x)
    """
    TB, N, C = x_ref.shape
    H, D = num_heads, head_dim
    M = TB * N

    # Collapse (TB, N) into one big M so the projection matmuls fill the MXU
    # and the weight push is amortized over TB sequences per grid step.
    x = x_ref[...].reshape(M, C)                                 # bf16

    # --- fused QKV projection: one (M, C) @ (C, 3C) bf16 matmul, fp32 acc ---
    qkv = jnp.dot(x, wqkv_ref[...], preferred_element_type=jnp.float32)
    bqkv = bqkv_ref[...]                                         # (1, 3C) fp32

    # --- attention per head, accumulating directly into the output proj -----
    # acc holds the running (M, C) fp32 result of attn_out @ W_proj; each head
    # contributes oh @ wproj[h*D:(h+1)*D, :], so no lane-axis concatenate and
    # only one head's temporaries are live at a time.
    # TODO(synk): for long sequences (N >= ~1k on v7x, ~2k on v5e/v6e) add a
    # query/KV-tile grid axis with an online softmax instead of materializing
    # the (TB, N, N) fp32 score block.
    acc = jnp.zeros((M, C), dtype=jnp.float32)
    for h in range(H):                                           # static unroll
        q0 = h * D
        k0 = C + h * D
        v0 = 2 * C + h * D

        # Bias + attention scale folded into the per-head slices; cast to bf16
        # only at the point of use (no full biased-qkv / q_all/k_all/v_all).
        qh = ((qkv[:, q0:q0 + D] + bqkv[:, q0:q0 + D]) * scale
              ).astype(jnp.bfloat16).reshape(TB, N, D)
        kh = (qkv[:, k0:k0 + D] + bqkv[:, k0:k0 + D]
              ).astype(jnp.bfloat16).reshape(TB, N, D)
        vh = (qkv[:, v0:v0 + D] + bqkv[:, v0:v0 + D]
              ).astype(jnp.bfloat16).reshape(TB, N, D)

        # Contraction over d on both operands -> no explicit k transpose.
        s = jnp.einsum('bnd,bmd->bnm', qh, kh,
                       preferred_element_type=jnp.float32)       # (TB,N,N) f32
        s = s - jnp.max(s, axis=-1, keepdims=True)
        p = jnp.exp(s)
        p = p * pl.reciprocal(jnp.sum(p, axis=-1, keepdims=True), approx=False)

        oh = jnp.einsum('bnm,bmd->bnd', p.astype(jnp.bfloat16), vh,
                        preferred_element_type=jnp.float32)      # (TB,N,D) f32
        oh = oh.reshape(M, D).astype(jnp.bfloat16)

        # Head contribution to the output projection (row slice of W_proj is
        # sublane-aligned since D % 8 == 0 for ViT head dims).
        acc = acc + jnp.dot(oh, wproj_ref[h * D:(h + 1) * D, :],
                            preferred_element_type=jnp.float32)  # (M, C) f32

    y = acc + bproj_ref[...]                                     # bias epilogue
    o_ref[...] = y.reshape(TB, N, C).astype(o_ref.dtype)


def _vmem_limit_bytes():
    """Generation-aware scoped-VMEM limit (v5e/v6e: 128 MiB physical,
    v7x: 64 MiB per TensorCore); leave headroom for compiler scratch."""
    try:
        cap = int(pltpu.get_tpu_info().vmem_capacity_bytes)
    except Exception:
        cap = 64 << 20          # conservative: assume v7x-sized VMEM
    return min(int(cap * 3 // 4), 96 << 20)


def _est_step_vmem_bytes(TB, N, C, H, out_itemsize):
    """Rough per-grid-step VMEM footprint of _mha_kernel."""
    M = TB * N
    D = C // H
    b = 0
    b += 2 * M * C * 2                          # bf16 x block, double-buffered
    b += 2 * M * C * out_itemsize               # output block, double-buffered
    b += (3 * C * C + C * C) * 2 + 4 * C * 4    # weights (single-buffer) + biases
    b += M * 3 * C * 4                          # fp32 qkv activations
    b += M * C * 4                              # fp32 projection accumulator
    b += TB * N * N * 4 + TB * N * N * 2        # fp32 scores + bf16 probs (1 head)
    b += 3 * M * D * 2 + M * D * 4              # one head's q/k/v bf16 + out fp32
    return b


def _pick_block_batch(B, N, C, H, out_itemsize, budget_bytes):
    """Largest divisor of B whose per-step footprint fits the VMEM budget.
    Keeps >=2 grid steps (so dimension_semantics can shard across the two
    TensorCores of a v7x chip) only when each step still carries >=512 rows
    (the ~85%-of-HBM-roofline regime); on 1-TC chips fewer, bigger steps win
    anyway and the extra step costs nothing when rows/step stay large."""
    divisors = [d for d in range(1, B + 1) if B % d == 0]
    fitting = [d for d in divisors
               if _est_step_vmem_bytes(d, N, C, H, out_itemsize) <= budget_bytes]
    if not fitting:
        return 1
    for d in sorted(fitting, reverse=True):
        if B // d >= 2 and d * N >= 512:
            return d
    return max(fitting)


def multi_head_attention(x, w_qkv, b_qkv, w_proj, b_proj, *, num_heads,
                         block_batch=None):
    """x: (B, N, C).  w_qkv: (3C, C) torch layout, b_qkv: (3C,),
    w_proj: (C, C) torch layout, b_proj: (C,)."""
    B, N, C = x.shape
    assert C % num_heads == 0
    head_dim = C // num_heads
    scale = head_dim ** (-0.5)
    out_dtype = x.dtype

    # Cast x to bf16 at the boundary: the kernel's first use of x is a bf16
    # matmul operand, so results are identical while input DMA bytes and the
    # double-buffered input block in VMEM are halved.
    x_bf16 = jnp.asarray(x).astype(jnp.bfloat16)

    # Pre-transpose + bf16-cast matmul weights (MXU is bf16-native); biases
    # stay fp32 and are added to fp32 accumulators inside the kernel.
    wqkv_t = jnp.asarray(w_qkv).T.astype(jnp.bfloat16)           # (C, 3C)
    wproj_t = jnp.asarray(w_proj).T.astype(jnp.bfloat16)         # (C, C)
    bqkv2 = jnp.asarray(b_qkv, dtype=jnp.float32).reshape(1, 3 * C)
    bproj2 = jnp.asarray(b_proj, dtype=jnp.float32).reshape(1, C)

    vmem_limit = _vmem_limit_bytes()
    budget = int(vmem_limit * 0.8)
    TB = (block_batch if block_batch is not None else
          _pick_block_batch(B, N, C, num_heads,
                            jnp.dtype(out_dtype).itemsize, budget))
    assert B % TB == 0

    # NOTE: real deployments should keep C a multiple of 128 (ViT C=768/1024
    # are fine) so output stores are lane-dense; the tiny test shapes below
    # are for correctness only.
    kernel = functools.partial(_mha_kernel, num_heads=num_heads,
                               head_dim=head_dim, scale=scale)

    def build(single_buffer_weights):
        if single_buffer_weights:
            def wspec(shape):
                return pl.BlockSpec(shape, lambda b: (0, 0),
                                    pipeline_mode=pl.Buffered(buffer_count=1))
        else:
            def wspec(shape):
                return pl.BlockSpec(shape, lambda b: (0, 0))
        return pl.pallas_call(
            kernel,
            out_shape=jax.ShapeDtypeStruct((B, N, C), out_dtype),
            grid_spec=pltpu.PrefetchScalarGridSpec(
                num_scalar_prefetch=0,
                grid=(B // TB,),
                in_specs=[
                    pl.BlockSpec((TB, N, C), lambda b: (b, 0, 0)),
                    wspec((C, 3 * C)),
                    wspec((1, 3 * C)),
                    wspec((C, C)),
                    wspec((1, C)),
                ],
                out_specs=pl.BlockSpec((TB, N, C), lambda b: (b, 0, 0)),
            ),
            compiler_params=pltpu.CompilerParams(
                dimension_semantics=("parallel",),
                vmem_limit_bytes=vmem_limit),
        )

    args = (x_bf16, wqkv_t, bqkv2, wproj_t, bproj2)
    try:
        # Grid-invariant weights/biases: request single-buffering so the
        # resident bf16 weights are not duplicated in VMEM.
        return build(True)(*args)
    except Exception:
        # TODO(synk): drop this fallback once pl.Buffered(1) on the top-level
        # pallas_call grid is confirmed on the deployed jax version; default
        # double-buffering is correct, just wastes one weight copy of VMEM.
        return build(False)(*args)


def _reference(x, w_qkv, b_qkv, w_proj, b_proj, num_heads):
    """Pure-JAX fp32 reference mirroring the PyTorch forward (eval mode)."""
    B, N, C = x.shape
    D = C // num_heads
    scale = D ** (-0.5)
    qkv = x @ w_qkv.T + b_qkv                                   # (B, N, 3C)
    qkv = qkv.reshape(B, N, 3, num_heads, D).transpose(2, 0, 3, 1, 4)
    q, k, v = qkv[0], qkv[1], qkv[2]                            # (B, H, N, D)
    attn = jnp.einsum("bhnd,bhmd->bhnm", q, k) * scale
    attn = jax.nn.softmax(attn, axis=-1)
    out = jnp.einsum("bhnm,bhmd->bhnd", attn, v)                # (B, H, N, D)
    out = out.transpose(0, 2, 1, 3).reshape(B, N, C)
    return out @ w_proj.T + b_proj


def _run_case(key, B, N, C, H):
    kx, kw1, kb1, kw2, kb2 = jax.random.split(key, 5)
    x = jax.random.normal(kx, (B, N, C), dtype=jnp.float32)
    w_qkv = 0.02 * jax.random.normal(kw1, (3 * C, C), dtype=jnp.float32)
    b_qkv = 0.02 * jax.random.normal(kb1, (3 * C,), dtype=jnp.float32)
    w_proj = 0.02 * jax.random.normal(kw2, (C, C), dtype=jnp.float32)
    b_proj = 0.02 * jax.random.normal(kb2, (C,), dtype=jnp.float32)

    out = multi_head_attention(x, w_qkv, b_qkv, w_proj, b_proj, num_heads=H)
    out = jax.block_until_ready(out)

    ref = _reference(x, w_qkv, b_qkv, w_proj, b_proj, H)
    assert out.shape == (B, N, C)
    # bf16 matmul operands -> loosened tolerance vs the fp32 reference.
    max_err = float(jnp.max(jnp.abs(out - ref)))
    assert jnp.allclose(out, ref, atol=2e-2, rtol=2e-2), (
        f"mismatch vs reference (max abs err {max_err})")


if __name__ == "__main__":
    root = jax.random.PRNGKey(0)
    k1, k2 = jax.random.split(root)
    # Small shapes consistent with the module: B=2, seq N=8, embed C=32, heads=4.
    _run_case(k1, B=2, N=8, C=32, H=4)
    # Exercises the multi-head accumulation path at a larger head count.
    _run_case(k2, B=8, N=8, C=64, H=8)
    print("KERNEL_OK")
</pallas_src>

<mosaic_0001>
module attributes {stable_mosaic.version = 11 : i64} {
  func.func @_mha_kernel(%arg0: i32, %arg1: memref<2x8x32xbf16, #tpu.memory_space<vmem>>, %arg2: memref<32x96xbf16, #tpu.memory_space<vmem>>, %arg3: memref<1x96xf32, #tpu.memory_space<vmem>>, %arg4: memref<32x32xbf16, #tpu.memory_space<vmem>>, %arg5: memref<1x32xf32, #tpu.memory_space<vmem>>, %arg6: memref<2x8x32xf32, #tpu.memory_space<vmem>>) attributes {dimension_semantics = [#tpu.dimension_semantics<parallel>], iteration_bounds = array<i64: 1>, scalar_prefetch = 0 : i64, scratch_operands = 0 : i64, tpu.core_type = #tpu.core_type<tc>, window_params = [{transform_indices = @transform_0, window_bounds = array<i64: 2, 8, 32>}, {pipeline_mode = #tpu.pipeline_mode<synchronous>, transform_indices = @transform_1, window_bounds = array<i64: 32, 96>}, {pipeline_mode = #tpu.pipeline_mode<synchronous>, transform_indices = @transform_2, window_bounds = array<i64: 1, 96>}, {pipeline_mode = #tpu.pipeline_mode<synchronous>, transform_indices = @transform_3, window_bounds = array<i64: 32, 32>}, {pipeline_mode = #tpu.pipeline_mode<synchronous>, transform_indices = @transform_4, window_bounds = array<i64: 1, 32>}, {transform_indices = @transform_5, window_bounds = array<i64: 2, 8, 32>}]} {
    %c0 = arith.constant 0 : index
    %c0_0 = arith.constant 0 : index
    %c0_1 = arith.constant 0 : index
    %0 = vector.load %arg1[%c0, %c0_0, %c0_1] : memref<2x8x32xbf16, #tpu.memory_space<vmem>>, vector<2x8x32xbf16>
    %1 = vector.shape_cast %0 : vector<2x8x32xbf16> to vector<16x32xbf16>
    %c0_2 = arith.constant 0 : index
    %c0_3 = arith.constant 0 : index
    %2 = vector.load %arg2[%c0_2, %c0_3] : memref<32x96xbf16, #tpu.memory_space<vmem>>, vector<32x96xbf16>
    %cst = arith.constant dense<0.000000e+00> : vector<16x96xf32>
    %3 = tpu.matmul %1, %2, %cst {dimension_numbers = #tpu.dot_dimension_numbers<[1], [0], [0], [1], [0, 0, 1, 1], [], []>} : vector<16x32xbf16>, vector<32x96xbf16>, vector<16x96xf32> -> vector<16x96xf32>
    %c0_4 = arith.constant 0 : index
    %c0_5 = arith.constant 0 : index
    %4 = vector.load %arg3[%c0_4, %c0_5] : memref<1x96xf32, #tpu.memory_space<vmem>>, vector<1x96xf32>
    %cst_6 = arith.constant 0.000000e+00 : f32
    %5 = vector.broadcast %cst_6 : f32 to vector<16x32xf32>
    %6 = vector.extract_strided_slice %3 {offsets = [0, 0], sizes = [16, 8], strides = [1, 1]} : vector<16x96xf32> to vector<16x8xf32>
    %7 = vector.extract_strided_slice %4 {offsets = [0, 0], sizes = [1, 8], strides = [1, 1]} : vector<1x96xf32> to vector<1x8xf32>
    %8 = vector.broadcast %7 : vector<1x8xf32> to vector<16x8xf32>
    %9 = arith.addf %6, %8 : vector<16x8xf32>
    %cst_7 = arith.constant 0.353553385 : f32
    %10 = vector.broadcast %cst_7 : f32 to vector<16x8xf32>
    %11 = arith.mulf %9, %10 : vector<16x8xf32>
    %12 = arith.truncf %11 : vector<16x8xf32> to vector<16x8xbf16>
    %13 = vector.shape_cast %12 : vector<16x8xbf16> to vector<2x8x8xbf16>
    %14 = vector.extract_strided_slice %3 {offsets = [0, 32], sizes = [16, 8], strides = [1, 1]} : vector<16x96xf32> to vector<16x8xf32>
    %15 = vector.extract_strided_slice %4 {offsets = [0, 32], sizes = [1, 8], strides = [1, 1]} : vector<1x96xf32> to vector<1x8xf32>
    %16 = vector.broadcast %15 : vector<1x8xf32> to vector<16x8xf32>
    %17 = arith.addf %14, %16 : vector<16x8xf32>
    %18 = arith.truncf %17 : vector<16x8xf32> to vector<16x8xbf16>
    %19 = vector.shape_cast %18 : vector<16x8xbf16> to vector<2x8x8xbf16>
    %20 = vector.extract_strided_slice %3 {offsets = [0, 64], sizes = [16, 8], strides = [1, 1]} : vector<16x96xf32> to vector<16x8xf32>
    %21 = vector.extract_strided_slice %4 {offsets = [0, 64], sizes = [1, 8], strides = [1, 1]} : vector<1x96xf32> to vector<1x8xf32>
    %22 = vector.broadcast %21 : vector<1x8xf32> to vector<16x8xf32>
    %23 = arith.addf %20, %22 : vector<16x8xf32>
    %24 = arith.truncf %23 : vector<16x8xf32> to vector<16x8xbf16>
    %25 = vector.shape_cast %24 : vector<16x8xbf16> to vector<2x8x8xbf16>
    "tpu.trace_start"() <{level = 10 : i32, message = "bnd,bmd->bnm"}> : () -> ()
    %cst_8 = arith.constant dense<0.000000e+00> : vector<2x8x8xf32>
    %26 = tpu.matmul %13, %19, %cst_8 {dimension_numbers = #tpu.dot_dimension_numbers<[2], [2], [1], [1], [0, 0, 0, 1, 1, 1], [0], [0]>} : vector<2x8x8xbf16>, vector<2x8x8xbf16>, vector<2x8x8xf32> -> vector<2x8x8xf32>
    "tpu.trace_stop"() : () -> ()
    %cst_9 = arith.constant dense<0xFF800000> : vector<2x8xf32>
    %27 = vector.multi_reduction <maximumf>, %26, %cst_9 [2] : vector<2x8x8xf32> to vector<2x8xf32>
    %28 = vector.shape_cast %27 : vector<2x8xf32> to vector<2x8x1xf32>
    %29 = vector.broadcast %28 : vector<2x8x1xf32> to vector<2x8x8xf32>
    %30 = arith.subf %26, %29 : vector<2x8x8xf32>
    %31 = math.exp %30 : vector<2x8x8xf32>
    %cst_10 = arith.constant dense<0.000000e+00> : vector<2x8xf32>
    %32 = vector.multi_reduction <add>, %31, %cst_10 [2] : vector<2x8x8xf32> to vector<2x8xf32>
    %33 = vector.shape_cast %32 : vector<2x8xf32> to vector<2x8x1xf32>
    %34 = tpu.reciprocal %33 : vector<2x8x1xf32> -> vector<2x8x1xf32>
    %35 = vector.broadcast %34 : vector<2x8x1xf32> to vector<2x8x8xf32>
    %36 = arith.mulf %31, %35 : vector<2x8x8xf32>
    %37 = arith.truncf %36 : vector<2x8x8xf32> to vector<2x8x8xbf16>
    "tpu.trace_start"() <{level = 10 : i32, message = "bnm,bmd->bnd"}> : () -> ()
    %cst_11 = arith.constant dense<0.000000e+00> : vector<2x8x8xf32>
    %38 = tpu.matmul %37, %25, %cst_11 {dimension_numbers = #tpu.dot_dimension_numbers<[2], [1], [1], [2], [0, 0, 0, 1, 1, 2], [0], [0]>} : vector<2x8x8xbf16>, vector<2x8x8xbf16>, vector<2x8x8xf32> -> vector<2x8x8xf32>
    "tpu.trace_stop"() : () -> ()
    %39 = vector.shape_cast %38 : vector<2x8x8xf32> to vector<16x8xf32>
    %40 = arith.truncf %39 : vector<16x8xf32> to vector<16x8xbf16>
    %c0_12 = arith.constant 0 : index
    %c0_13 = arith.constant 0 : index
    %41 = vector.load %arg4[%c0_12, %c0_13] : memref<32x32xbf16, #tpu.memory_space<vmem>>, vector<8x32xbf16>
    %cst_14 = arith.constant dense<0.000000e+00> : vector<16x32xf32>
    %42 = tpu.matmul %40, %41, %cst_14 {dimension_numbers = #tpu.dot_dimension_numbers<[1], [0], [0], [1], [0, 0, 1, 1], [], []>} : vector<16x8xbf16>, vector<8x32xbf16>, vector<16x32xf32> -> vector<16x32xf32>
    %43 = arith.addf %5, %42 : vector<16x32xf32>
    %44 = vector.extract_strided_slice %3 {offsets = [0, 8], sizes = [16, 8], strides = [1, 1]} : vector<16x96xf32> to vector<16x8xf32>
    %45 = vector.extract_strided_slice %4 {offsets = [0, 8], sizes = [1, 8], strides = [1, 1]} : vector<1x96xf32> to vector<1x8xf32>
    %46 = vector.broadcast %45 : vector<1x8xf32> to vector<16x8xf32>
    %47 = arith.addf %44, %46 : vector<16x8xf32>
    %cst_15 = arith.constant 0.353553385 : f32
    %48 = vector.broadcast %cst_15 : f32 to vector<16x8xf32>
    %49 = arith.mulf %47, %48 : vector<16x8xf32>
    %50 = arith.truncf %49 : vector<16x8xf32> to vector<16x8xbf16>
    %51 = vector.shape_cast %50 : vector<16x8xbf16> to vector<2x8x8xbf16>
    %52 = vector.extract_strided_slice %3 {offsets = [0, 40], sizes = [16, 8], strides = [1, 1]} : vector<16x96xf32> to vector<16x8xf32>
    %53 = vector.extract_strided_slice %4 {offsets = [0, 40], sizes = [1, 8], strides = [1, 1]} : vector<1x96xf32> to vector<1x8xf32>
    %54 = vector.broadcast %53 : vector<1x8xf32> to vector<16x8xf32>
    %55 = arith.addf %52, %54 : vector<16x8xf32>
    %56 = arith.truncf %55 : vector<16x8xf32> to vector<16x8xbf16>
    %57 = vector.shape_cast %56 : vector<16x8xbf16> to vector<2x8x8xbf16>
    %58 = vector.extract_strided_slice %3 {offsets = [0, 72], sizes = [16, 8], strides = [1, 1]} : vector<16x96xf32> to vector<16x8xf32>
    %59 = vector.extract_strided_slice %4 {offsets = [0, 72], sizes = [1, 8], strides = [1, 1]} : vector<1x96xf32> to vector<1x8xf32>
    %60 = vector.broadcast %59 : vector<1x8xf32> to vector<16x8xf32>
    %61 = arith.addf %58, %60 : vector<16x8xf32>
    %62 = arith.truncf %61 : vector<16x8xf32> to vector<16x8xbf16>
    %63 = vector.shape_cast %62 : vector<16x8xbf16> to vector<2x8x8xbf16>
    "tpu.trace_start"() <{level = 10 : i32, message = "bnd,bmd->bnm"}> : () -> ()
    %cst_16 = arith.constant dense<0.000000e+00> : vector<2x8x8xf32>
    %64 = tpu.matmul %51, %57, %cst_16 {dimension_numbers = #tpu.dot_dimension_numbers<[2], [2], [1], [1], [0, 0, 0, 1, 1, 1], [0], [0]>} : vector<2x8x8xbf16>, vector<2x8x8xbf16>, vector<2x8x8xf32> -> vector<2x8x8xf32>
    "tpu.trace_stop"() : () -> ()
    %cst_17 = arith.constant dense<0xFF800000> : vector<2x8xf32>
    %65 = vector.multi_reduction <maximumf>, %64, %cst_17 [2] : vector<2x8x8xf32> to vector<2x8xf32>
    %66 = vector.shape_cast %65 : vector<2x8xf32> to vector<2x8x1xf32>
    %67 = vector.broadcast %66 : vector<2x8x1xf32> to vector<2x8x8xf32>
    %68 = arith.subf %64, %67 : vector<2x8x8xf32>
    %69 = math.exp %68 : vector<2x8x8xf32>
    %cst_18 = arith.constant dense<0.000000e+00> : vector<2x8xf32>
    %70 = vector.multi_reduction <add>, %69, %cst_18 [2] : vector<2x8x8xf32> to vector<2x8xf32>
    %71 = vector.shape_cast %70 : vector<2x8xf32> to vector<2x8x1xf32>
    %72 = tpu.reciprocal %71 : vector<2x8x1xf32> -> vector<2x8x1xf32>
    %73 = vector.broadcast %72 : vector<2x8x1xf32> to vector<2x8x8xf32>
    %74 = arith.mulf %69, %73 : vector<2x8x8xf32>
    %75 = arith.truncf %74 : vector<2x8x8xf32> to vector<2x8x8xbf16>
    "tpu.trace_start"() <{level = 10 : i32, message = "bnm,bmd->bnd"}> : () -> ()
    %cst_19 = arith.constant dense<0.000000e+00> : vector<2x8x8xf32>
    %76 = tpu.matmul %75, %63, %cst_19 {dimension_numbers = #tpu.dot_dimension_numbers<[2], [1], [1], [2], [0, 0, 0, 1, 1, 2], [0], [0]>} : vector<2x8x8xbf16>, vector<2x8x8xbf16>, vector<2x8x8xf32> -> vector<2x8x8xf32>
    "tpu.trace_stop"() : () -> ()
    %77 = vector.shape_cast %76 : vector<2x8x8xf32> to vector<16x8xf32>
    %78 = arith.truncf %77 : vector<16x8xf32> to vector<16x8xbf16>
    %c8 = arith.constant 8 : index
    %c0_20 = arith.constant 0 : index
    %79 = vector.load %arg4[%c8, %c0_20] : memref<32x32xbf16, #tpu.memory_space<vmem>>, vector<8x32xbf16>
    %cst_21 = arith.constant dense<0.000000e+00> : vector<16x32xf32>
    %80 = tpu.matmul %78, %79, %cst_21 {dimension_numbers = #tpu.dot_dimension_numbers<[1], [0], [0], [1], [0, 0, 1, 1], [], []>} : vector<16x8xbf16>, vector<8x32xbf16>, vector<16x32xf32> -> vector<16x32xf32>
    %81 = arith.addf %43, %80 : vector<16x32xf32>
    %82 = vector.extract_strided_slice %3 {offsets = [0, 16], sizes = [16, 8], strides = [1, 1]} : vector<16x96xf32> to vector<16x8xf32>
    %83 = vector.extract_strided_slice %4 {offsets = [0, 16], sizes = [1, 8], strides = [1, 1]} : vector<1x96xf32> to vector<1x8xf32>
    %84 = vector.broadcast %83 : vector<1x8xf32> to vector<16x8xf32>
    %85 = arith.addf %82, %84 : vector<16x8xf32>
    %cst_22 = arith.constant 0.353553385 : f32
    %86 = vector.broadcast %cst_22 : f32 to vector<16x8xf32>
    %87 = arith.mulf %85, %86 : vector<16x8xf32>
    %88 = arith.truncf %87 : vector<16x8xf32> to vector<16x8xbf16>
    %89 = vector.shape_cast %88 : vector<16x8xbf16> to vector<2x8x8xbf16>
    %90 = vector.extract_strided_slice %3 {offsets = [0, 48], sizes = [16, 8], strides = [1, 1]} : vector<16x96xf32> to vector<16x8xf32>
    %91 = vector.extract_strided_slice %4 {offsets = [0, 48], sizes = [1, 8], strides = [1, 1]} : vector<1x96xf32> to vector<1x8xf32>
    %92 = vector.broadcast %91 : vector<1x8xf32> to vector<16x8xf32>
    %93 = arith.addf %90, %92 : vector<16x8xf32>
    %94 = arith.truncf %93 : vector<16x8xf32> to vector<16x8xbf16>
    %95 = vector.shape_cast %94 : vector<16x8xbf16> to vector<2x8x8xbf16>
    %96 = vector.extract_strided_slice %3 {offsets = [0, 80], sizes = [16, 8], strides = [1, 1]} : vector<16x96xf32> to vector<16x8xf32>
    %97 = vector.extract_strided_slice %4 {offsets = [0, 80], sizes = [1, 8], strides = [1, 1]} : vector<1x96xf32> to vector<1x8xf32>
    %98 = vector.broadcast %97 : vector<1x8xf32> to vector<16x8xf32>
    %99 = arith.addf %96, %98 : vector<16x8xf32>
    %100 = arith.truncf %99 : vector<16x8xf32> to vector<16x8xbf16>
    %101 = vector.shape_cast %100 : vector<16x8xbf16> to vector<2x8x8xbf16>
    "tpu.trace_start"() <{level = 10 : i32, message = "bnd,bmd->bnm"}> : () -> ()
    %cst_23 = arith.constant dense<0.000000e+00> : vector<2x8x8xf32>
    %102 = tpu.matmul %89, %95, %cst_23 {dimension_numbers = #tpu.dot_dimension_numbers<[2], [2], [1], [1], [0, 0, 0, 1, 1, 1], [0], [0]>} : vector<2x8x8xbf16>, vector<2x8x8xbf16>, vector<2x8x8xf32> -> vector<2x8x8xf32>
    "tpu.trace_stop"() : () -> ()
    %cst_24 = arith.constant dense<0xFF800000> : vector<2x8xf32>
    %103 = vector.multi_reduction <maximumf>, %102, %cst_24 [2] : vector<2x8x8xf32> to vector<2x8xf32>
    %104 = vector.shape_cast %103 : vector<2x8xf32> to vector<2x8x1xf32>
    %105 = vector.broadcast %104 : vector<2x8x1xf32> to vector<2x8x8xf32>
    %106 = arith.subf %102, %105 : vector<2x8x8xf32>
    %107 = math.exp %106 : vector<2x8x8xf32>
    %cst_25 = arith.constant dense<0.000000e+00> : vector<2x8xf32>
    %108 = vector.multi_reduction <add>, %107, %cst_25 [2] : vector<2x8x8xf32> to vector<2x8xf32>
    %109 = vector.shape_cast %108 : vector<2x8xf32> to vector<2x8x1xf32>
    %110 = tpu.reciprocal %109 : vector<2x8x1xf32> -> vector<2x8x1xf32>
    %111 = vector.broadcast %110 : vector<2x8x1xf32> to vector<2x8x8xf32>
    %112 = arith.mulf %107, %111 : vector<2x8x8xf32>
    %113 = arith.truncf %112 : vector<2x8x8xf32> to vector<2x8x8xbf16>
    "tpu.trace_start"() <{level = 10 : i32, message = "bnm,bmd->bnd"}> : () -> ()
    %cst_26 = arith.constant dense<0.000000e+00> : vector<2x8x8xf32>
    %114 = tpu.matmul %113, %101, %cst_26 {dimension_numbers = #tpu.dot_dimension_numbers<[2], [1], [1], [2], [0, 0, 0, 1, 1, 2], [0], [0]>} : vector<2x8x8xbf16>, vector<2x8x8xbf16>, vector<2x8x8xf32> -> vector<2x8x8xf32>
    "tpu.trace_stop"() : () -> ()
    %115 = vector.shape_cast %114 : vector<2x8x8xf32> to vector<16x8xf32>
    %116 = arith.truncf %115 : vector<16x8xf32> to vector<16x8xbf16>
    %c16 = arith.constant 16 : index
    %c0_27 = arith.constant 0 : index
    %117 = vector.load %arg4[%c16, %c0_27] : memref<32x32xbf16, #tpu.memory_space<vmem>>, vector<8x32xbf16>
    %cst_28 = arith.constant dense<0.000000e+00> : vector<16x32xf32>
    %118 = tpu.matmul %116, %117, %cst_28 {dimension_numbers = #tpu.dot_dimension_numbers<[1], [0], [0], [1], [0, 0, 1, 1], [], []>} : vector<16x8xbf16>, vector<8x32xbf16>, vector<16x32xf32> -> vector<16x32xf32>
    %119 = arith.addf %81, %118 : vector<16x32xf32>
    %120 = vector.extract_strided_slice %3 {offsets = [0, 24], sizes = [16, 8], strides = [1, 1]} : vector<16x96xf32> to vector<16x8xf32>
    %121 = vector.extract_strided_slice %4 {offsets = [0, 24], sizes = [1, 8], strides = [1, 1]} : vector<1x96xf32> to vector<1x8xf32>
    %122 = vector.broadcast %121 : vector<1x8xf32> to vector<16x8xf32>
    %123 = arith.addf %120, %122 : vector<16x8xf32>
    %cst_29 = arith.constant 0.353553385 : f32
    %124 = vector.broadcast %cst_29 : f32 to vector<16x8xf32>
    %125 = arith.mulf %123, %124 : vector<16x8xf32>
    %126 = arith.truncf %125 : vector<16x8xf32> to vector<16x8xbf16>
    %127 = vector.shape_cast %126 : vector<16x8xbf16> to vector<2x8x8xbf16>
    %128 = vector.extract_strided_slice %3 {offsets = [0, 56], sizes = [16, 8], strides = [1, 1]} : vector<16x96xf32> to vector<16x8xf32>
    %129 = vector.extract_strided_slice %4 {offsets = [0, 56], sizes = [1, 8], strides = [1, 1]} : vector<1x96xf32> to vector<1x8xf32>
    %130 = vector.broadcast %129 : vector<1x8xf32> to vector<16x8xf32>
    %131 = arith.addf %128, %130 : vector<16x8xf32>
    %132 = arith.truncf %131 : vector<16x8xf32> to vector<16x8xbf16>
    %133 = vector.shape_cast %132 : vector<16x8xbf16> to vector<2x8x8xbf16>
    %134 = vector.extract_strided_slice %3 {offsets = [0, 88], sizes = [16, 8], strides = [1, 1]} : vector<16x96xf32> to vector<16x8xf32>
    %135 = vector.extract_strided_slice %4 {offsets = [0, 88], sizes = [1, 8], strides = [1, 1]} : vector<1x96xf32> to vector<1x8xf32>
    %136 = vector.broadcast %135 : vector<1x8xf32> to vector<16x8xf32>
    %137 = arith.addf %134, %136 : vector<16x8xf32>
    %138 = arith.truncf %137 : vector<16x8xf32> to vector<16x8xbf16>
    %139 = vector.shape_cast %138 : vector<16x8xbf16> to vector<2x8x8xbf16>
    "tpu.trace_start"() <{level = 10 : i32, message = "bnd,bmd->bnm"}> : () -> ()
    %cst_30 = arith.constant dense<0.000000e+00> : vector<2x8x8xf32>
    %140 = tpu.matmul %127, %133, %cst_30 {dimension_numbers = #tpu.dot_dimension_numbers<[2], [2], [1], [1], [0, 0, 0, 1, 1, 1], [0], [0]>} : vector<2x8x8xbf16>, vector<2x8x8xbf16>, vector<2x8x8xf32> -> vector<2x8x8xf32>
    "tpu.trace_stop"() : () -> ()
    %cst_31 = arith.constant dense<0xFF800000> : vector<2x8xf32>
    %141 = vector.multi_reduction <maximumf>, %140, %cst_31 [2] : vector<2x8x8xf32> to vector<2x8xf32>
    %142 = vector.shape_cast %141 : vector<2x8xf32> to vector<2x8x1xf32>
    %143 = vector.broadcast %142 : vector<2x8x1xf32> to vector<2x8x8xf32>
    %144 = arith.subf %140, %143 : vector<2x8x8xf32>
    %145 = math.exp %144 : vector<2x8x8xf32>
    %cst_32 = arith.constant dense<0.000000e+00> : vector<2x8xf32>
    %146 = vector.multi_reduction <add>, %145, %cst_32 [2] : vector<2x8x8xf32> to vector<2x8xf32>
    %147 = vector.shape_cast %146 : vector<2x8xf32> to vector<2x8x1xf32>
    %148 = tpu.reciprocal %147 : vector<2x8x1xf32> -> vector<2x8x1xf32>
    %149 = vector.broadcast %148 : vector<2x8x1xf32> to vector<2x8x8xf32>
    %150 = arith.mulf %145, %149 : vector<2x8x8xf32>
    %151 = arith.truncf %150 : vector<2x8x8xf32> to vector<2x8x8xbf16>
    "tpu.trace_start"() <{level = 10 : i32, message = "bnm,bmd->bnd"}> : () -> ()
    %cst_33 = arith.constant dense<0.000000e+00> : vector<2x8x8xf32>
    %152 = tpu.matmul %151, %139, %cst_33 {dimension_numbers = #tpu.dot_dimension_numbers<[2], [1], [1], [2], [0, 0, 0, 1, 1, 2], [0], [0]>} : vector<2x8x8xbf16>, vector<2x8x8xbf16>, vector<2x8x8xf32> -> vector<2x8x8xf32>
    "tpu.trace_stop"() : () -> ()
    %153 = vector.shape_cast %152 : vector<2x8x8xf32> to vector<16x8xf32>
    %154 = arith.truncf %153 : vector<16x8xf32> to vector<16x8xbf16>
    %c24 = arith.constant 24 : index
    %c0_34 = arith.constant 0 : index
    %155 = vector.load %arg4[%c24, %c0_34] : memref<32x32xbf16, #tpu.memory_space<vmem>>, vector<8x32xbf16>
    %cst_35 = arith.constant dense<0.000000e+00> : vector<16x32xf32>
    %156 = tpu.matmul %154, %155, %cst_35 {dimension_numbers = #tpu.dot_dimension_numbers<[1], [0], [0], [1], [0, 0, 1, 1], [], []>} : vector<16x8xbf16>, vector<8x32xbf16>, vector<16x32xf32> -> vector<16x32xf32>
    %157 = arith.addf %119, %156 : vector<16x32xf32>
    %c0_36 = arith.constant 0 : index
    %c0_37 = arith.constant 0 : index
    %158 = vector.load %arg5[%c0_36, %c0_37] : memref<1x32xf32, #tpu.memory_space<vmem>>, vector<1x32xf32>
    %159 = vector.broadcast %158 : vector<1x32xf32> to vector<16x32xf32>
    %160 = arith.addf %157, %159 : vector<16x32xf32>
    %161 = vector.shape_cast %160 : vector<16x32xf32> to vector<2x8x32xf32>
    %c0_38 = arith.constant 0 : index
    %c0_39 = arith.constant 0 : index
    %c0_40 = arith.constant 0 : index
    %162 = vector.load %arg6[%c0_38, %c0_39, %c0_40] : memref<2x8x32xf32, #tpu.memory_space<vmem>>, vector<2x8x32xf32>
    tpu.vector_store %arg6[%c0_38, %c0_39, %c0_40], %161 {strides = array<i32>} : memref<2x8x32xf32, #tpu.memory_space<vmem>>, vector<2x8x32xf32>,
    return
  }
  func.func @transform_0(%arg0: i32) -> (i32, i32, i32) {
    %c0_i32 = arith.constant 0 : i32
    %c0_i32_0 = arith.constant 0 : i32
    %c0_i32_1 = arith.constant 0 : i32
    return %arg0, %c0_i32, %c0_i32_0 : i32, i32, i32
  }
  func.func @transform_1(%arg0: i32) -> (i32, i32) {
    %c0_i32 = arith.constant 0 : i32
    %c0_i32_0 = arith.constant 0 : i32
    %c0_i32_1 = arith.constant 0 : i32
    return %c0_i32, %c0_i32_0 : i32, i32
  }
  func.func @transform_2(%arg0: i32) -> (i32, i32) {
    %c0_i32 = arith.constant 0 : i32
    %c0_i32_0 = arith.constant 0 : i32
    %c0_i32_1 = arith.constant 0 : i32
    return %c0_i32, %c0_i32_0 : i32, i32
  }
  func.func @transform_3(%arg0: i32) -> (i32, i32) {
    %c0_i32 = arith.constant 0 : i32
    %c0_i32_0 = arith.constant 0 : i32
    %c0_i32_1 = arith.constant 0 : i32
    return %c0_i32, %c0_i32_0 : i32, i32
  }
  func.func @transform_4(%arg0: i32) -> (i32, i32) {
    %c0_i32 = arith.constant 0 : i32
    %c0_i32_0 = arith.constant 0 : i32
    %c0_i32_1 = arith.constant 0 : i32
    return %c0_i32, %c0_i32_0 : i32, i32
  }
  func.func @transform_5(%arg0: i32) -> (i32, i32, i32) {
    %c0_i32 = arith.constant 0 : i32
    %c0_i32_0 = arith.constant 0 : i32
    %c0_i32_1 = arith.constant 0 : i32
    return %arg0, %c0_i32, %c0_i32_0 : i32, i32, i32
  }
}

module attributes {stable_mosaic.version = 11 : i64} {
  func.func @_mha_kernel(%arg0: i32, %arg1: memref<2x8x32xbf16, #tpu.memory_space<vmem>>, %arg2: memref<32x96xbf16, #tpu.memory_space<vmem>>, %arg3: memref<1x96xf32, #tpu.memory_space<vmem>>, %arg4: memref<32x32xbf16, #tpu.memory_space<vmem>>, %arg5: memref<1x32xf32, #tpu.memory_space<vmem>>, %arg6: memref<2x8x32xf32, #tpu.memory_space<vmem>>) attributes {dimension_semantics = [#tpu.dimension_semantics<parallel>], iteration_bounds = array<i64: 1>, scalar_prefetch = 0 : i64, scratch_operands = 0 : i64, tpu.core_type = #tpu.core_type<tc>, window_params = [{transform_indices = @transform_0, window_bounds = array<i64: 2, 8, 32>}, {pipeline_mode = #tpu.pipeline_mode<synchronous>, transform_indices = @transform_1, window_bounds = array<i64: 32, 96>}, {pipeline_mode = #tpu.pipeline_mode<synchronous>, transform_indices = @transform_2, window_bounds = array<i64: 1, 96>}, {pipeline_mode = #tpu.pipeline_mode<synchronous>, transform_indices = @transform_3, window_bounds = array<i64: 32, 32>}, {pipeline_mode = #tpu.pipeline_mode<synchronous>, transform_indices = @transform_4, window_bounds = array<i64: 1, 32>}, {transform_indices = @transform_5, window_bounds = array<i64: 2, 8, 32>}]} {
    %c0 = arith.constant 0 : index
    %c0_0 = arith.constant 0 : index
    %c0_1 = arith.constant 0 : index
    %0 = vector.load %arg1[%c0, %c0_0, %c0_1] : memref<2x8x32xbf16, #tpu.memory_space<vmem>>, vector<2x8x32xbf16>
    %1 = vector.shape_cast %0 : vector<2x8x32xbf16> to vector<16x32xbf16>
    %c0_2 = arith.constant 0 : index
    %c0_3 = arith.constant 0 : index
    %2 = vector.load %arg2[%c0_2, %c0_3] : memref<32x96xbf16, #tpu.memory_space<vmem>>, vector<32x96xbf16>
    %cst = arith.constant dense<0.000000e+00> : vector<16x96xf32>
    %3 = tpu.matmul %1, %2, %cst {dimension_numbers = #tpu.dot_dimension_numbers<[1], [0], [0], [1], [0, 0, 1, 1], [], []>} : vector<16x32xbf16>, vector<32x96xbf16>, vector<16x96xf32> -> vector<16x96xf32>
    %c0_4 = arith.constant 0 : index
    %c0_5 = arith.constant 0 : index
    %4 = vector.load %arg3[%c0_4, %c0_5] : memref<1x96xf32, #tpu.memory_space<vmem>>, vector<1x96xf32>
    %cst_6 = arith.constant 0.000000e+00 : f32
    %5 = vector.broadcast %cst_6 : f32 to vector<16x32xf32>
    %6 = vector.extract_strided_slice %3 {offsets = [0, 0], sizes = [16, 8], strides = [1, 1]} : vector<16x96xf32> to vector<16x8xf32>
    %7 = vector.extract_strided_slice %4 {offsets = [0, 0], sizes = [1, 8], strides = [1, 1]} : vector<1x96xf32> to vector<1x8xf32>
    %8 = vector.broadcast %7 : vector<1x8xf32> to vector<16x8xf32>
    %9 = arith.addf %6, %8 : vector<16x8xf32>
    %cst_7 = arith.constant 0.353553385 : f32
    %10 = vector.broadcast %cst_7 : f32 to vector<16x8xf32>
    %11 = arith.mulf %9, %10 : vector<16x8xf32>
    %12 = arith.truncf %11 : vector<16x8xf32> to vector<16x8xbf16>
    %13 = vector.shape_cast %12 : vector<16x8xbf16> to vector<2x8x8xbf16>
    %14 = vector.extract_strided_slice %3 {offsets = [0, 32], sizes = [16, 8], strides = [1, 1]} : vector<16x96xf32> to vector<16x8xf32>
    %15 = vector.extract_strided_slice %4 {offsets = [0, 32], sizes = [1, 8], strides = [1, 1]} : vector<1x96xf32> to vector<1x8xf32>
    %16 = vector.broadcast %15 : vector<1x8xf32> to vector<16x8xf32>
    %17 = arith.addf %14, %16 : vector<16x8xf32>
    %18 = arith.truncf %17 : vector<16x8xf32> to vector<16x8xbf16>
    %19 = vector.shape_cast %18 : vector<16x8xbf16> to vector<2x8x8xbf16>
    %20 = vector.extract_strided_slice %3 {offsets = [0, 64], sizes = [16, 8], strides = [1, 1]} : vector<16x96xf32> to vector<16x8xf32>
    %21 = vector.extract_strided_slice %4 {offsets = [0, 64], sizes = [1, 8], strides = [1, 1]} : vector<1x96xf32> to vector<1x8xf32>
    %22 = vector.broadcast %21 : vector<1x8xf32> to vector<16x8xf32>
    %23 = arith.addf %20, %22 : vector<16x8xf32>
    %24 = arith.truncf %23 : vector<16x8xf32> to vector<16x8xbf16>
    %25 = vector.shape_cast %24 : vector<16x8xbf16> to vector<2x8x8xbf16>
    "tpu.trace_start"() <{level = 10 : i32, message = "bnd,bmd->bnm"}> : () -> ()
    %cst_8 = arith.constant dense<0.000000e+00> : vector<2x8x8xf32>
    %26 = tpu.matmul %13, %19, %cst_8 {dimension_numbers = #tpu.dot_dimension_numbers<[2], [2], [1], [1], [0, 0, 0, 1, 1, 1], [0], [0]>} : vector<2x8x8xbf16>, vector<2x8x8xbf16>, vector<2x8x8xf32> -> vector<2x8x8xf32>
    "tpu.trace_stop"() : () -> ()
    %cst_9 = arith.constant dense<0xFF800000> : vector<2x8xf32>
    %27 = vector.multi_reduction <maximumf>, %26, %cst_9 [2] : vector<2x8x8xf32> to vector<2x8xf32>
    %28 = vector.shape_cast %27 : vector<2x8xf32> to vector<2x8x1xf32>
    %29 = vector.broadcast %28 : vector<2x8x1xf32> to vector<2x8x8xf32>
    %30 = arith.subf %26, %29 : vector<2x8x8xf32>
    %31 = math.exp %30 : vector<2x8x8xf32>
    %cst_10 = arith.constant dense<0.000000e+00> : vector<2x8xf32>
    %32 = vector.multi_reduction <add>, %31, %cst_10 [2] : vector<2x8x8xf32> to vector<2x8xf32>
    %33 = vector.shape_cast %32 : vector<2x8xf32> to vector<2x8x1xf32>
    %34 = tpu.reciprocal %33 : vector<2x8x1xf32> -> vector<2x8x1xf32>
    %35 = vector.broadcast %34 : vector<2x8x1xf32> to vector<2x8x8xf32>
    %36 = arith.mulf %31, %35 : vector<2x8x8xf32>
    %37 = arith.truncf %36 : vector<2x8x8xf32> to vector<2x8x8xbf16>
    "tpu.trace_start"() <{level = 10 : i32, message = "bnm,bmd->bnd"}> : () -> ()
    %cst_11 = arith.constant dense<0.000000e+00> : vector<2x8x8xf32>
    %38 = tpu.matmul %37, %25, %cst_11 {dimension_numbers = #tpu.dot_dimension_numbers<[2], [1], [1], [2], [0, 0, 0, 1, 1, 2], [0], [0]>} : vector<2x8x8xbf16>, vector<2x8x8xbf16>, vector<2x8x8xf32> -> vector<2x8x8xf32>
    "tpu.trace_stop"() : () -> ()
    %39 = vector.shape_cast %38 : vector<2x8x8xf32> to vector<16x8xf32>
    %40 = arith.truncf %39 : vector<16x8xf32> to vector<16x8xbf16>
    %c0_12 = arith.constant 0 : index
    %c0_13 = arith.constant 0 : index
    %41 = vector.load %arg4[%c0_12, %c0_13] : memref<32x32xbf16, #tpu.memory_space<vmem>>, vector<8x32xbf16>
    %cst_14 = arith.constant dense<0.000000e+00> : vector<16x32xf32>
    %42 = tpu.matmul %40, %41, %cst_14 {dimension_numbers = #tpu.dot_dimension_numbers<[1], [0], [0], [1], [0, 0, 1, 1], [], []>} : vector<16x8xbf16>, vector<8x32xbf16>, vector<16x32xf32> -> vector<16x32xf32>
    %43 = arith.addf %5, %42 : vector<16x32xf32>
    %44 = vector.extract_strided_slice %3 {offsets = [0, 8], sizes = [16, 8], strides = [1, 1]} : vector<16x96xf32> to vector<16x8xf32>
    %45 = vector.extract_strided_slice %4 {offsets = [0, 8], sizes = [1, 8], strides = [1, 1]} : vector<1x96xf32> to vector<1x8xf32>
    %46 = vector.broadcast %45 : vector<1x8xf32> to vector<16x8xf32>
    %47 = arith.addf %44, %46 : vector<16x8xf32>
    %cst_15 = arith.constant 0.353553385 : f32
    %48 = vector.broadcast %cst_15 : f32 to vector<16x8xf32>
    %49 = arith.mulf %47, %48 : vector<16x8xf32>
    %50 = arith.truncf %49 : vector<16x8xf32> to vector<16x8xbf16>
    %51 = vector.shape_cast %50 : vector<16x8xbf16> to vector<2x8x8xbf16>
    %52 = vector.extract_strided_slice %3 {offsets = [0, 40], sizes = [16, 8], strides = [1, 1]} : vector<16x96xf32> to vector<16x8xf32>
    %53 = vector.extract_strided_slice %4 {offsets = [0, 40], sizes = [1, 8], strides = [1, 1]} : vector<1x96xf32> to vector<1x8xf32>
    %54 = vector.broadcast %53 : vector<1x8xf32> to vector<16x8xf32>
    %55 = arith.addf %52, %54 : vector<16x8xf32>
    %56 = arith.truncf %55 : vector<16x8xf32> to vector<16x8xbf16>
    %57 = vector.shape_cast %56 : vector<16x8xbf16> to vector<2x8x8xbf16>
    %58 = vector.extract_strided_slice %3 {offsets = [0, 72], sizes = [16, 8], strides = [1, 1]} : vector<16x96xf32> to vector<16x8xf32>
    %59 = vector.extract_strided_slice %4 {offsets = [0, 72], sizes = [1, 8], strides = [1, 1]} : vector<1x96xf32> to vector<1x8xf32>
    %60 = vector.broadcast %59 : vector<1x8xf32> to vector<16x8xf32>
    %61 = arith.addf %58, %60 : vector<16x8xf32>
    %62 = arith.truncf %61 : vector<16x8xf32> to vector<16x8xbf16>
    %63 = vector.shape_cast %62 : vector<16x8xbf16> to vector<2x8x8xbf16>
    "tpu.trace_start"() <{level = 10 : i32, message = "bnd,bmd->bnm"}> : () -> ()
    %cst_16 = arith.constant dense<0.000000e+00> : vector<2x8x8xf32>
    %64 = tpu.matmul %51, %57, %cst_16 {dimension_numbers = #tpu.dot_dimension_numbers<[2], [2], [1], [1], [0, 0, 0, 1, 1, 1], [0], [0]>} : vector<2x8x8xbf16>, vector<2x8x8xbf16>, vector<2x8x8xf32> -> vector<2x8x8xf32>
    "tpu.trace_stop"() : () -> ()
    %cst_17 = arith.constant dense<0xFF800000> : vector<2x8xf32>
    %65 = vector.multi_reduction <maximumf>, %64, %cst_17 [2] : vector<2x8x8xf32> to vector<2x8xf32>
    %66 = vector.shape_cast %65 : vector<2x8xf32> to vector<2x8x1xf32>
    %67 = vector.broadcast %66 : vector<2x8x1xf32> to vector<2x8x8xf32>
    %68 = arith.subf %64, %67 : vector<2x8x8xf32>
    %69 = math.exp %68 : vector<2x8x8xf32>
    %cst_18 = arith.constant dense<0.000000e+00> : vector<2x8xf32>
    %70 = vector.multi_reduction <add>, %69, %cst_18 [2] : vector<2x8x8xf32> to vector<2x8xf32>
    %71 = vector.shape_cast %70 : vector<2x8xf32> to vector<2x8x1xf32>
    %72 = tpu.reciprocal %71 : vector<2x8x1xf32> -> vector<2x8x1xf32>
    %73 = vector.broadcast %72 : vector<2x8x1xf32> to vector<2x8x8xf32>
    %74 = arith.mulf %69, %73 : vector<2x8x8xf32>
    %75 = arith.truncf %74 : vector<2x8x8xf32> to vector<2x8x8xbf16>
    "tpu.trace_start"() <{level = 10 : i32, message = "bnm,bmd->bnd"}> : () -> ()
    %cst_19 = arith.constant dense<0.000000e+00> : vector<2x8x8xf32>
    %76 = tpu.matmul %75, %63, %cst_19 {dimension_numbers = #tpu.dot_dimension_numbers<[2], [1], [1], [2], [0, 0, 0, 1, 1, 2], [0], [0]>} : vector<2x8x8xbf16>, vector<2x8x8xbf16>, vector<2x8x8xf32> -> vector<2x8x8xf32>
    "tpu.trace_stop"() : () -> ()
    %77 = vector.shape_cast %76 : vector<2x8x8xf32> to vector<16x8xf32>
    %78 = arith.truncf %77 : vector<16x8xf32> to vector<16x8xbf16>
    %c8 = arith.constant 8 : index
    %c0_20 = arith.constant 0 : index
    %79 = vector.load %arg4[%c8, %c0_20] : memref<32x32xbf16, #tpu.memory_space<vmem>>, vector<8x32xbf16>
    %cst_21 = arith.constant dense<0.000000e+00> : vector<16x32xf32>
    %80 = tpu.matmul %78, %79, %cst_21 {dimension_numbers = #tpu.dot_dimension_numbers<[1], [0], [0], [1], [0, 0, 1, 1], [], []>} : vector<16x8xbf16>, vector<8x32xbf16>, vector<16x32xf32> -> vector<16x32xf32>
    %81 = arith.addf %43, %80 : vector<16x32xf32>
    %82 = vector.extract_strided_slice %3 {offsets = [0, 16], sizes = [16, 8], strides = [1, 1]} : vector<16x96xf32> to vector<16x8xf32>
    %83 = vector.extract_strided_slice %4 {offsets = [0, 16], sizes = [1, 8], strides = [1, 1]} : vector<1x96xf32> to vector<1x8xf32>
    %84 = vector.broadcast %83 : vector<1x8xf32> to vector<16x8xf32>
    %85 = arith.addf %82, %84 : vector<16x8xf32>
    %cst_22 = arith.constant 0.353553385 : f32
    %86 = vector.broadcast %cst_22 : f32 to vector<16x8xf32>
    %87 = arith.mulf %85, %86 : vector<16x8xf32>
    %88 = arith.truncf %87 : vector<16x8xf32> to vector<16x8xbf16>
    %89 = vector.shape_cast %88 : vector<16x8xbf16> to vector<2x8x8xbf16>
    %90 = vector.extract_strided_slice %3 {offsets = [0, 48], sizes = [16, 8], strides = [1, 1]} : vector<16x96xf32> to vector<16x8xf32>
    %91 = vector.extract_strided_slice %4 {offsets = [0, 48], sizes = [1, 8], strides = [1, 1]} : vector<1x96xf32> to vector<1x8xf32>
    %92 = vector.broadcast %91 : vector<1x8xf32> to vector<16x8xf32>
    %93 = arith.addf %90, %92 : vector<16x8xf32>
    %94 = arith.truncf %93 : vector<16x8xf32> to vector<16x8xbf16>
    %95 = vector.shape_cast %94 : vector<16x8xbf16> to vector<2x8x8xbf16>
    %96 = vector.extract_strided_slice %3 {offsets = [0, 80], sizes = [16, 8], strides = [1, 1]} : vector<16x96xf32> to vector<16x8xf32>
    %97 = vector.extract_strided_slice %4 {offsets = [0, 80], sizes = [1, 8], strides = [1, 1]} : vector<1x96xf32> to vector<1x8xf32>
    %98 = vector.broadcast %97 : vector<1x8xf32> to vector<16x8xf32>
    %99 = arith.addf %96, %98 : vector<16x8xf32>
    %100 = arith.truncf %99 : vector<16x8xf32> to vector<16x8xbf16>
    %101 = vector.shape_cast %100 : vector<16x8xbf16> to vector<2x8x8xbf16>
    "tpu.trace_start"() <{level = 10 : i32, message = "bnd,bmd->bnm"}> : () -> ()
    %cst_23 = arith.constant dense<0.000000e+00> : vector<2x8x8xf32>
    %102 = tpu.matmul %89, %95, %cst_23 {dimension_numbers = #tpu.dot_dimension_numbers<[2], [2], [1], [1], [0, 0, 0, 1, 1, 1], [0], [0]>} : vector<2x8x8xbf16>, vector<2x8x8xbf16>, vector<2x8x8xf32> -> vector<2x8x8xf32>
    "tpu.trace_stop"() : () -> ()
    %cst_24 = arith.constant dense<0xFF800000> : vector<2x8xf32>
    %103 = vector.multi_reduction <maximumf>, %102, %cst_24 [2] : vector<2x8x8xf32> to vector<2x8xf32>
    %104 = vector.shape_cast %103 : vector<2x8xf32> to vector<2x8x1xf32>
    %105 = vector.broadcast %104 : vector<2x8x1xf32> to vector<2x8x8xf32>
    %106 = arith.subf %102, %105 : vector<2x8x8xf32>
    %107 = math.exp %106 : vector<2x8x8xf32>
    %cst_25 = arith.constant dense<0.000000e+00> : vector<2x8xf32>
    %108 = vector.multi_reduction <add>, %107, %cst_25 [2] : vector<2x8x8xf32> to vector<2x8xf32>
    %109 = vector.shape_cast %108 : vector<2x8xf32> to vector<2x8x1xf32>
    %110 = tpu.reciprocal %109 : vector<2x8x1xf32> -> vector<2x8x1xf32>
    %111 = vector.broadcast %110 : vector<2x8x1xf32> to vector<2x8x8xf32>
    %112 = arith.mulf %107, %111 : vector<2x8x8xf32>
    %113 = arith.truncf %112 : vector<2x8x8xf32> to vector<2x8x8xbf16>
    "tpu.trace_start"() <{level = 10 : i32, message = "bnm,bmd->bnd"}> : () -> ()
    %cst_26 = arith.constant dense<0.000000e+00> : vector<2x8x8xf32>
    %114 = tpu.matmul %113, %101, %cst_26 {dimension_numbers = #tpu.dot_dimension_numbers<[2], [1], [1], [2], [0, 0, 0, 1, 1, 2], [0], [0]>} : vector<2x8x8xbf16>, vector<2x8x8xbf16>, vector<2x8x8xf32> -> vector<2x8x8xf32>
    "tpu.trace_stop"() : () -> ()
    %115 = vector.shape_cast %114 : vector<2x8x8xf32> to vector<16x8xf32>
    %116 = arith.truncf %115 : vector<16x8xf32> to vector<16x8xbf16>
    %c16 = arith.constant 16 : index
    %c0_27 = arith.constant 0 : index
    %117 = vector.load %arg4[%c16, %c0_27] : memref<32x32xbf16, #tpu.memory_space<vmem>>, vector<8x32xbf16>
    %cst_28 = arith.constant dense<0.000000e+00> : vector<16x32xf32>
    %118 = tpu.matmul %116, %117, %cst_28 {dimension_numbers = #tpu.dot_dimension_numbers<[1], [0], [0], [1], [0, 0, 1, 1], [], []>} : vector<16x8xbf16>, vector<8x32xbf16>, vector<16x32xf32> -> vector<16x32xf32>
    %119 = arith.addf %81, %118 : vector<16x32xf32>
    %120 = vector.extract_strided_slice %3 {offsets = [0, 24], sizes = [16, 8], strides = [1, 1]} : vector<16x96xf32> to vector<16x8xf32>
    %121 = vector.extract_strided_slice %4 {offsets = [0, 24], sizes = [1, 8], strides = [1, 1]} : vector<1x96xf32> to vector<1x8xf32>
    %122 = vector.broadcast %121 : vector<1x8xf32> to vector<16x8xf32>
    %123 = arith.addf %120, %122 : vector<16x8xf32>
    %cst_29 = arith.constant 0.353553385 : f32
    %124 = vector.broadcast %cst_29 : f32 to vector<16x8xf32>
    %125 = arith.mulf %123, %124 : vector<16x8xf32>
    %126 = arith.truncf %125 : vector<16x8xf32> to vector<16x8xbf16>
    %127 = vector.shape_cast %126 : vector<16x8xbf16> to vector<2x8x8xbf16>
    %128 = vector.extract_strided_slice %3 {offsets = [0, 56], sizes = [16, 8], strides = [1, 1]} : vector<16x96xf32> to vector<16x8xf32>
    %129 = vector.extract_strided_slice %4 {offsets = [0, 56], sizes = [1, 8], strides = [1, 1]} : vector<1x96xf32> to vector<1x8xf32>
    %130 = vector.broadcast %129 : vector<1x8xf32> to vector<16x8xf32>
    %131 = arith.addf %128, %130 : vector<16x8xf32>
    %132 = arith.truncf %131 : vector<16x8xf32> to vector<16x8xbf16>
    %133 = vector.shape_cast %132 : vector<16x8xbf16> to vector<2x8x8xbf16>
    %134 = vector.extract_strided_slice %3 {offsets = [0, 88], sizes = [16, 8], strides = [1, 1]} : vector<16x96xf32> to vector<16x8xf32>
    %135 = vector.extract_strided_slice %4 {offsets = [0, 88], sizes = [1, 8], strides = [1, 1]} : vector<1x96xf32> to vector<1x8xf32>
    %136 = vector.broadcast %135 : vector<1x8xf32> to vector<16x8xf32>
    %137 = arith.addf %134, %136 : vector<16x8xf32>
    %138 = arith.truncf %137 : vector<16x8xf32> to vector<16x8xbf16>
    %139 = vector.shape_cast %138 : vector<16x8xbf16> to vector<2x8x8xbf16>
    "tpu.trace_start"() <{level = 10 : i32, message = "bnd,bmd->bnm"}> : () -> ()
    %cst_30 = arith.constant dense<0.000000e+00> : vector<2x8x8xf32>
    %140 = tpu.matmul %127, %133, %cst_30 {dimension_numbers = #tpu.dot_dimension_numbers<[2], [2], [1], [1], [0, 0, 0, 1, 1, 1], [0], [0]>} : vector<2x8x8xbf16>, vector<2x8x8xbf16>, vector<2x8x8xf32> -> vector<2x8x8xf32>
    "tpu.trace_stop"() : () -> ()
    %cst_31 = arith.constant dense<0xFF800000> : vector<2x8xf32>
    %141 = vector.multi_reduction <maximumf>, %140, %cst_31 [2] : vector<2x8x8xf32> to vector<2x8xf32>
    %142 = vector.shape_cast %141 : vector<2x8xf32> to vector<2x8x1xf32>
    %143 = vector.broadcast %142 : vector<2x8x1xf32> to vector<2x8x8xf32>
    %144 = arith.subf %140, %143 : vector<2x8x8xf32>
    %145 = math.exp %144 : vector<2x8x8xf32>
    %cst_32 = arith.constant dense<0.000000e+00> : vector<2x8xf32>
    %146 = vector.multi_reduction <add>, %145, %cst_32 [2] : vector<2x8x8xf32> to vector<2x8xf32>
    %147 = vector.shape_cast %146 : vector<2x8xf32> to vector<2x8x1xf32>
    %148 = tpu.reciprocal %147 : vector<2x8x1xf32> -> vector<2x8x1xf32>
    %149 = vector.broadcast %148 : vector<2x8x1xf32> to vector<2x8x8xf32>
    %150 = arith.mulf %145, %149 : vector<2x8x8xf32>
    %151 = arith.truncf %150 : vector<2x8x8xf32> to vector<2x8x8xbf16>
    "tpu.trace_start"() <{level = 10 : i32, message = "bnm,bmd->bnd"}> : () -> ()
    %cst_33 = arith.constant dense<0.000000e+00> : vector<2x8x8xf32>
    %152 = tpu.matmul %151, %139, %cst_33 {dimension_numbers = #tpu.dot_dimension_numbers<[2], [1], [1], [2], [0, 0, 0, 1, 1, 2], [0], [0]>} : vector<2x8x8xbf16>, vector<2x8x8xbf16>, vector<2x8x8xf32> -> vector<2x8x8xf32>
    "tpu.trace_stop"() : () -> ()
    %153 = vector.shape_cast %152 : vector<2x8x8xf32> to vector<16x8xf32>
    %154 = arith.truncf %153 : vector<16x8xf32> to vector<16x8xbf16>
    %c24 = arith.constant 24 : index
    %c0_34 = arith.constant 0 : index
    %155 = vector.load %arg4[%c24, %c0_34] : memref<32x32xbf16, #tpu.memory_space<vmem>>, vector<8x32xbf16>
    %cst_35 = arith.constant dense<0.000000e+00> : vector<16x32xf32>
    %156 = tpu.matmul %154, %155, %cst_35 {dimension_numbers = #tpu.dot_dimension_numbers<[1], [0], [0], [1], [0, 0, 1, 1], [], []>} : vector<16x8xbf16>, vector<8x32xbf16>, vector<16x32xf32> -> vector<16x32xf32>
    %157 = arith.addf %119, %156 : vector<16x32xf32>
    %c0_36 = arith.constant 0 : index
    %c0_37 = arith.constant 0 : index
    %158 = vector.load %arg5[%c0_36, %c0_37] : memref<1x32xf32, #tpu.memory_space<vmem>>, vector<1x32xf32>
    %159 = vector.broadcast %158 : vector<1x32xf32> to vector<16x32xf32>
    %160 = arith.addf %157, %159 : vector<16x32xf32>
    %161 = vector.shape_cast %160 : vector<16x32xf32> to vector<2x8x32xf32>
    %c0_38 = arith.constant 0 : index
    %c0_39 = arith.constant 0 : index
    %c0_40 = arith.constant 0 : index
    %162 = vector.load %arg6[%c0_38, %c0_39, %c0_40] : memref<2x8x32xf32, #tpu.memory_space<vmem>>, vector<2x8x32xf32>
    tpu.vector_store %arg6[%c0_38, %c0_39, %c0_40], %161 {strides = array<i32>} : memref<2x8x32xf32, #tpu.memory_space<vmem>>, vector<2x8x32xf32>,
    return
  }
  func.func @transform_0(%arg0: i32) -> (i32, i32, i32) {
    %c0_i32 = arith.constant 0 : i32
    %c0_i32_0 = arith.constant 0 : i32
    %c0_i32_1 = arith.constant 0 : i32
    return %arg0, %c0_i32, %c0_i32_0 : i32, i32, i32
  }
  func.func @transform_1(%arg0: i32) -> (i32, i32) {
    %c0_i32 = arith.constant 0 : i32
    %c0_i32_0 = arith.constant 0 : i32
    %c0_i32_1 = arith.constant 0 : i32
    return %c0_i32, %c0_i32_0 : i32, i32
  }
  func.func @transform_2(%arg0: i32) -> (i32, i32) {
    %c0_i32 = arith.constant 0 : i32
    %c0_i32_0 = arith.constant 0 : i32
    %c0_i32_1 = arith.constant 0 : i32
    return %c0_i32, %c0_i32_0 : i32, i32
  }
  func.func @transform_3(%arg0: i32) -> (i32, i32) {
    %c0_i32 = arith.constant 0 : i32
    %c0_i32_0 = arith.constant 0 : i32
    %c0_i32_1 = arith.constant 0 : i32
    return %c0_i32, %c0_i32_0 : i32, i32
  }
  func.func @transform_4(%arg0: i32) -> (i32, i32) {
    %c0_i32 = arith.constant 0 : i32
    %c0_i32_0 = arith.constant 0 : i32
    %c0_i32_1 = arith.constant 0 : i32
    return %c0_i32, %c0_i32_0 : i32, i32
  }
  func.func @transform_5(%arg0: i32) -> (i32, i32, i32) {
    %c0_i32 = arith.constant 0 : i32
    %c0_i32_0 = arith.constant 0 : i32
    %c0_i32_1 = arith.constant 0 : i32
    return %arg0, %c0_i32, %c0_i32_0 : i32, i32, i32
  }
}

</mosaic_0001>

<bundles_post_ra>
// kernel: tpu_custom_call.1
= control target key start
LH: loop header
LB: loop body
LE: loop exit
PB: predicated region body
PF: predicated region fallthrough
CT: control target
= control target key end

     0   :  { %10 = vsyncpa [#allocation3], 0  ;;  %s1190_s0 = inlined_call_operand.hbm [shape: bf16[2,8,32], index: 0, kind: input, shape index: {}]   ;;  %s1191_s1 = inlined_call_operand.hbm [shape: bf16[32,96], index: 1, kind: input, shape index: {}]   ;;  %s1192_s2 = inlined_call_operand.vmem [shape: f32[1,96], index: 2, kind: input, shape index: {}]   ;;  %s1193_s3 = inlined_call_operand.hbm [shape: bf16[32,32], index: 3, kind: input, shape index: {}]   ;;  %s1194_s4 = inlined_call_operand.vmem [shape: f32[1,32], index: 4, kind: input, shape index: {}]   ;;  %s1195_s5 = inlined_call_operand.hbm [shape: f32[2,8,32], index: 5, kind: output, shape index: {}]  }
   0x1   :  { %11 = vsyncpa [#allocation6], 0 }
   0x2   :  { %12 = vsyncpa [#allocation4], 0  ;;  %s30_s20 = sshll.u32 %s1191_s1, 4  ;;  %s994_s21 = smov [#allocation5]   ;;  %s31_s20 = int_to_ptr.hbm [resolvable:$true] %s30_s20 }
   0x3   :  { %s32_s22 = sshll.u32 %s994_s21, 4  ;;  %s17_s25 = sshll.u32 %s1190_s0, 4  ;;  %s33_s22 = int_to_ptr.vmem [resolvable:$true] %s32_s22  ;;  %s18_s25 = int_to_ptr.hbm [resolvable:$true] %s17_s25 }
   0x4   :  { %s995_s26 = smov 64   ;;  %s996_s27 = smov 4  }
   0x5   :  { %38 = dma.hbm_to_vmem [thread:$0]  %s31_s20, 256, %s33_s22, [#allocation6], %s995_s26, %s995_s26, %s996_s27  }
   0x6   :  { %s997_s28 = smov [#allocation2]   ;;  %s45_s1 = sshll.u32 %s1193_s3, 4  ;;  %s46_s1 = int_to_ptr.hbm [resolvable:$true] %s45_s1 }
   0x7   :  { %s19_s29 = sshll.u32 %s997_s28, 4  ;;  %s998_s7 = smov [#allocation7]   ;;  %s20_s29 = int_to_ptr.vmem [resolvable:$true] %s19_s29 }
   0x8   :  { %25 = dma.hbm_to_vmem [thread:$0]  %s18_s25, 128, %s20_s29, [#allocation3], %s995_s26, %s995_s26, %s996_s27  }
   0x9   :  { %s47_s8 = sshll.u32 %s998_s7, 4  ;;  %s48_s8 = int_to_ptr.vmem [resolvable:$true] %s47_s8 }
   0xa   :  { %53 = dma.hbm_to_vmem [thread:$0]  %s46_s1, 256, %s48_s8, [#allocation6], %s995_s26, %s995_s26, %s996_s27  }
   0xb   :  { %988 = dma.done.wait [#allocation3], 128  }
   0xc   :  { %989 = vsyncadd [#allocation3], 4294967168 }
   0xd   :  { %990 = dma.done.wait [#allocation6], 512  }
   0xe   :  { %991 = vsyncadd [#allocation6], 4294966784  ;;  %v839_v0 = vld [vmem:[#allocation5 + $0x8] sm:$0xff]  ;;  %v838_v1 = vld [vmem:[#allocation5] sm:$0xff]  ;;  %vm92_vm0 = vcmask 261120   ;;  %s999_s9 = smov 96  }
   0xf   :  { %102 = vmatpush.bf16.msra.mxu0 %v839_v0  ;;  %v837_v2 = vld [vmem:[#allocation2] sm:$0xff]  ;;  %s1000_s10 = smov 88   ;;  %s1002_s11 = smov 56   ;;  %vm127_vm1 = vcmask 64512   ;;  %vm226_vm2 = vcmask 1043456  }
  0x10   :  { %v858_v3 = vld [vmem:[%s1192_s2] ss:$0 sm:$0xff]  ;;  %s1001_s2 = smov 120   ;;  %s1003_s12 = smov 80  }
  0x11   :  { %s1004_s13 = smov 112   ;;  %s1005_s14 = smov 48  }
  0x12   :  { %s1006_s15 = smov 72   ;;  %s1007_s16 = smov 104  }
  0x13   :  { %103 = vmatpush.bf16.msra.mxu0 %v838_v1  ;;  %s1008_s17 = smov 40   ;;  %s1009_s20 = smov [#allocation8]  }
  0x14   :  { %s788_s21 = sshll.u32 %s1009_s20, 4  ;;  %s790_s24 = sshll.u32 %s1195_s5, 4  ;;  %s789_s21 = int_to_ptr.vmem [resolvable:$true] %s788_s21  ;;  %s791_s24 = int_to_ptr.hbm [resolvable:$true] %s790_s24 }
  0x15   :  { %s1011_s25 = smov 8  }
  0x16   :  { %816 = vmatmul.msk.bf16.vlgmr.msra.gmra.mxu0 %vm92_vm0, %v837_v2 }
  0x93   :  { %v105_v4 = vpop.f32.mrf.mxu0 }
  0x94   :  { %v114_v5 = vadd.f32 %v858_v3, %v105_v4 }
  0x96   :  { %v116_v6 = vmul.f32 0.35355338, %v114_v5  ;;  %v120_v7 = vpack.c.bf16 %v114_v5, %v114_v5 }
  0x98   :  { %v123_v8 = vunpack.c.l.b16 %v120_v7  ;;  %v118_v9 = vpack.c.bf16 %v116_v6, %v116_v6  ;;  %v411_v6 = vld [vmem:[#allocation7 + $0x4] sm:$0xf] }
  0x9a   :  { %v1061_v10 = vpack.c.b16 %v123_v8, %v123_v8  ;;  %v267_v15 = vunpack.c.l.b16 %v118_v9  ;;  %v416_v8 = vsel %vm226_vm2, %v411_v6, 0 }
  0x9b   :  { %v107_v11 = vpop.f32.mrf.mxu0 }
  0x9c   :  { %v115_v12 = vadd.f32 %v858_v3, %v107_v11  ;;  %125 = vrot.lane.b32.xlu1 %v1061_v10, %s999_s9  ;;  %271 = vrot.lane.b32.xlu0 %v1061_v10, %s1000_s10  ;;  %v1067_v19 = vpack.c.b16 %v267_v15, %v267_v15 }
  0x9e   :  { %v117_v13 = vmul.f32 0.35355338, %v115_v12  ;;  %v121_v14 = vpack.c.bf16 %v115_v12, %v115_v12 }
  0xa0   :  { %v148_v16 = vunpack.c.l.b16 %v121_v14  ;;  %v119_v17 = vpack.c.bf16 %v117_v13, %v117_v13 }
  0xa2   :  { %v1065_v18 = vpack.c.b16 %v148_v16, %v148_v16  ;;  %v293_v20 = vunpack.c.l.b16 %v119_v17 }
  0xa4   :  { %269 = vrot.lane.b32.xlu0 %v1067_v19, %s1001_s2  ;;  %297 = vrot.lane.b32.xlu2 %v1065_v18, %s1000_s10  ;;  %v1072_v21 = vpack.c.b16 %v293_v20, %v293_v20 }
  0xa5   :  { %150 = vrot.lane.b32.xlu1 %v1065_v18, %s999_s9 }
  0xac   :  { %295 = vrot.lane.b32.xlu2 %v1072_v21, %s1001_s2 }
  0xb4   :  { %368 = vrot.lane.b32.xlu2 %v1061_v10, %s1002_s11 }
  0xfe   :  { %v298_v22 = vpop.permute.xlu2 %297 }
  0xff   :  { %v303_v28 = vsel %vm127_vm1, %v298_v22, 0 }
 0x106   :  { %v296_v23 = vpop.permute.xlu2 %295 }
 0x10e   :  { %v126_v24 = vpop.permute.xlu1 %125  ;;  %v272_v25 = vpop.permute.xlu0 %271 }
 0x10f   :  { %v132_v26 = vsel %vm127_vm1, %v126_v24, 0  ;;  %v277_v27 = vsel %vm127_vm1, %v272_v25, 0  ;;  %v369_v29 = vpop.permute.xlu2 %368 }
 0x110   :  { %141 = vmatpush.bf16.xpose.msra.mxu1 %v132_v26  ;;  %286 = vmatpush.bf16.xpose.msrb.mxu0 %v277_v27  ;;  %v374_v33 = vsel %vm226_vm2, %v369_v29, 0 }
 0x116   :  { %v270_v30 = vpop.permute.xlu0 %269 }
 0x117   :  { %v151_v31 = vpop.permute.xlu1 %150  ;;  %817 = vmatmul.msk.bf16.vlgmr.msra.gmra.mxu1 %vm127_vm1, %v118_v9  ;;  %821 = vmatmul.msk.bf16.vlgmr.msrb.gmra.mxu0 %vm127_vm1, %v270_v30 }
 0x118   :  { %312 = vmatpush.bf16.xpose.msrb.mxu1 %v303_v28  ;;  %v156_v32 = vsel %vm127_vm1, %v151_v31, 0  ;;  %425 = vmatpush.bf16.msra.mxu0 %v416_v8 }
 0x119   :  { %165 = vmatpush.bf16.xpose.msra.mxu2 %v156_v32 }
 0x120   :  { %818 = vmatmul.msk.bf16.vlgmr.msra.gmra.mxu2 %vm127_vm1, %v119_v17 }
 0x121   :  { %383 = vmatpush.bf16.msrb.mxu2 %v374_v33 }
 0x127   :  { %822 = vmatmul.msk.bf16.vlgmr.msrb.gmra.mxu1 %vm127_vm1, %v296_v23 }
 0x194   :  { %v143_v34 = vpop.f32.mrf.mxu1  ;;  %v288_v35 = vpop.f32.mrf.mxu0 }
 0x195   :  { %v318_v36 = vsel %vm127_vm1, %v288_v35, -inf  ;;  %v171_v37 = vsel %vm127_vm1, %v143_v34, -inf }
 0x196   :  { %319 = vmax.xlane.f32.xlu0 %v318_v36  ;;  %172 = vmax.xlane.f32.xlu2 %v171_v37 }
 0x19c   :  { %v145_v38 = vpop.f32.mrf.mxu1  ;;  %v290_v39 = vpop.f32.mrf.mxu0 }
 0x1a3   :  { %v167_v40 = vpop.f32.mrf.mxu2 }
 0x1a4   :  { %v314_v41 = vpop.f32.mrf.mxu1  ;;  %v174_v42 = vsel %vm127_vm1, %v167_v40, -inf }
 0x1a5   :  { %175 = vmax.xlane.f32.xlu2 %v174_v42  ;;  %v321_v45 = vsel %vm127_vm1, %v314_v41, -inf }
 0x1aa   :  { %454 = vrot.lane.b32.xlu0 %v1061_v10, %s1003_s12 }
 0x1ab   :  { %v169_v43 = vpop.f32.mrf.mxu2 }
 0x1ac   :  { %v316_v44 = vpop.f32.mrf.mxu1 }
 0x1ad   :  { %322 = vmax.xlane.f32.xlu2 %v321_v45 }
 0x209   :  { %v320_v46 = vpop.xlane.xlu0 %319  ;;  %v173_v47 = vpop.xlane.xlu2 %172 }
 0x20a   :  { %v324_v48 = vsub.f32 %v288_v35, %v320_v46  ;;  %v177_v49 = vsub.f32 %v143_v34, %v173_v47 }
 0x20c   :  { %v326_v50 = vmul.f32 1.442695, %v324_v48  ;;  %v179_v51 = vmul.f32 1.442695, %v177_v49 }
 0x20e   :  { %860 = vpow2.f32 %v326_v50 }
 0x20f   :  { %862 = vpow2.f32 %v179_v51 }
 0x214   :  { %v1092_v52 = vpop.eup %860 }
 0x215   :  { %v1094_v53 = vpop.eup %862  ;;  %v330_v54 = vsel %vm127_vm1, %v1092_v52, 0.0 }
 0x216   :  { %331 = vadd.xlane.f32.xlu1 %v330_v54  ;;  %v183_v55 = vsel %vm127_vm1, %v1094_v53, 0.0 }
 0x217   :  { %184 = vadd.xlane.f32.xlu0 %v183_v55 }
 0x218   :  { %v176_v56 = vpop.xlane.xlu2 %175 }
 0x219   :  { %v178_v57 = vsub.f32 %v167_v40, %v176_v56 }
 0x21b   :  { %v181_v58 = vmul.f32 1.442695, %v178_v57 }
 0x21c   :  { %v455_v59 = vpop.permute.xlu0 %454 }
 0x21d   :  { %864 = vpow2.f32 %v181_v58  ;;  %v460_v60 = vsel %vm127_vm1, %v455_v59, 0 }
 0x21e   :  { %469 = vmatpush.bf16.xpose.msra.mxu2 %v460_v60 }
 0x220   :  { %v323_v61 = vpop.xlane.xlu2 %322 }
 0x221   :  { %v325_v62 = vsub.f32 %v314_v41, %v323_v61 }
 0x223   :  { %v1101_v63 = vpop.eup %864  ;;  %v328_v0 = vmul.f32 1.442695, %v325_v62 }
 0x224   :  { %v186_v1 = vsel %vm127_vm1, %v1101_v63, 0.0 }
 0x225   :  { %866 = vpow2.f32 %v328_v0  ;;  %187 = vadd.xlane.f32.xlu2 %v186_v1 }
 0x22b   :  { %v1105_v2 = vpop.eup %866 }
 0x22c   :  { %v333_v3 = vsel %vm127_vm1, %v1105_v2, 0.0 }
 0x22d   :  { %334 = vadd.xlane.f32.xlu2 %v333_v3 }
 0x22f   :  { %452 = vrot.lane.b32.xlu1 %v1067_v19, %s1004_s13 }
 0x237   :  { %221 = vrot.lane.b32.xlu1 %v1061_v10, %s995_s26 }
 0x23f   :  { %243 = vrot.lane.b32.xlu1 %v1065_v18, %s995_s26 }
 0x245   :  { %389 = vrot.lane.b32.xlu2 %v1065_v18, %s1002_s11 }
 0x247   :  { %477 = vrot.lane.b32.xlu1 %v1065_v18, %s1003_s12 }
 0x24d   :  { %548 = vrot.lane.b32.xlu2 %v1061_v10, %s1005_s14 }
 0x24f   :  { %475 = vrot.lane.b32.xlu1 %v1072_v21, %s1004_s13 }
 0x255   :  { %639 = vrot.lane.b32.xlu2 %v1065_v18, %s1006_s15 }
 0x25d   :  { %614 = vrot.lane.b32.xlu2 %v1067_v19, %s1007_s16 }
 0x265   :  { %637 = vrot.lane.b32.xlu2 %v1072_v21, %s1007_s16 }
 0x289   :  { %v332_v4 = vpop.xlane.xlu1 %331 }
 0x28a   :  { %868 = vrcp.f32 %v332_v4  ;;  %v185_v5 = vpop.xlane.xlu0 %184  ;;  %v347_v15 = vand.u32 2147483648, %v332_v4  ;;  %v345_v16 = vand.u32 2147483647, %v332_v4  ;;  %vm341_vm4 = vweird.f32 %v332_v4 }
 0x28b   :  { %870 = vrcp.f32 %v185_v5  ;;  %v200_v29 = vand.u32 2147483648, %v185_v5  ;;  %vm194_vm8 = vweird.f32 %v185_v5  ;;  %v198_v31 = vand.u32 2147483647, %v185_v5 }
 0x28c   :  { %v348_v21 = vor.u32 1.1754944e-38, %v347_v15  ;;  %vm346_vm6 = vcmp.eq.f32.partialorder %v345_v16, 8.507059e+37 }
 0x28d   :  { %v201_v35 = vor.u32 1.1754944e-38, %v200_v29  ;;  %vm199_vm10 = vcmp.eq.f32.partialorder %v198_v31, 8.507059e+37 }
 0x290   :  { %v869_v7 = vpop.eup %868 }
 0x291   :  { %v871_v9 = vpop.eup %870  ;;  %v337_v11 = vmul.f32 %v869_v7, %v332_v4  ;;  %vm342_vm3 = vweird.f32 %v869_v7 }
 0x292   :  { %v190_v12 = vmul.f32 %v871_v9, %v185_v5  ;;  %vm343_vm5 = vmor %vm341_vm4, %vm342_vm3  ;;  %vm195_vm7 = vweird.f32 %v871_v9 }
 0x293   :  { %v338_v13 = vsub.f32 1.0, %v337_v11  ;;  %vm196_vm9 = vmor %vm194_vm8, %vm195_vm7 }
 0x294   :  { %v191_v17 = vsub.f32 1.0, %v190_v12 }
 0x295   :  { %v339_v14 = vmul.f32 %v869_v7, %v338_v13 }
 0x296   :  { %v192_v22 = vmul.f32 %v871_v9, %v191_v17 }
 0x297   :  { %v340_v19 = vadd.f32 %v869_v7, %v339_v14 }
 0x298   :  { %v188_v20 = vpop.xlane.xlu2 %187  ;;  %v193_v27 = vadd.f32 %v871_v9, %v192_v22 }
 0x299   :  { %872 = vrcp.f32 %v188_v20  ;;  %v344_v23 = vsel %vm343_vm5, %v869_v7, %v340_v19  ;;  %v214_v46 = vand.u32 2147483648, %v188_v20  ;;  %vm208_vm12 = vweird.f32 %v188_v20 }
 0x29a   :  { %v349_v24 = vsel %vm346_vm6, %v348_v21, %v344_v23  ;;  %v197_v34 = vsel %vm196_vm9, %v871_v9, %v193_v27  ;;  %v212_v47 = vand.u32 2147483647, %v188_v20  ;;  %v265_v9 = vld [vmem:[#allocation7] sm:$0xf] }
 0x29b   :  { %v364_v25 = vmul.f32 %v1092_v52, %v349_v24  ;;  %v202_v36 = vsel %vm199_vm10, %v201_v35, %v197_v34  ;;  %v215_v54 = vor.u32 1.1754944e-38, %v214_v46  ;;  %v436_v11 = vsel %vm226_vm2, %v265_v9, 0 }
 0x29c   :  { %v217_v39 = vmul.f32 %v1094_v53, %v202_v36  ;;  %vm213_vm14 = vcmp.eq.f32.partialorder %v212_v47, 8.507059e+37  ;;  %445 = vmatpush.bf16.msra.mxu1 %v436_v11 }
 0x29d   :  { %v366_v26 = vpack.c.bf16 %v364_v25, %v364_v25 }
 0x29e   :  { %v219_v43 = vpack.c.bf16 %v217_v39, %v217_v39 }
 0x29f   :  { %v873_v28 = vpop.eup %872  ;;  %823 = vmatmul.msk.bf16.vlgmr.msrb.gmra.mxu2 %vm127_vm1, %v366_v26 }
 0x2a0   :  { %v335_v30 = vpop.xlane.xlu2 %334  ;;  %v204_v33 = vmul.f32 %v873_v28, %v188_v20  ;;  %vm209_vm11 = vweird.f32 %v873_v28 }
 0x2a1   :  { %v453_v32 = vpop.permute.xlu1 %452  ;;  %874 = vrcp.f32 %v335_v30  ;;  %vm210_vm13 = vmor %vm208_vm12, %vm209_vm11  ;;  %v361_v1 = vand.u32 2147483648, %v335_v30  ;;  %vm355_vm3 = vweird.f32 %v335_v30  ;;  %v359_v3 = vand.u32 2147483647, %v335_v30 }
 0x2a2   :  { %v205_v37 = vsub.f32 1.0, %v204_v33 }
 0x2a3   :  { %v362_v5 = vor.u32 1.1754944e-38, %v361_v1  ;;  %vm360_vm5 = vcmp.eq.f32.partialorder %v359_v3, 8.507059e+37 }
 0x2a4   :  { %v206_v41 = vmul.f32 %v873_v28, %v205_v37 }
 0x2a6   :  { %v207_v44 = vadd.f32 %v873_v28, %v206_v41 }
 0x2a7   :  { %v875_v45 = vpop.eup %874 }
 0x2a8   :  { %v390_v38 = vpop.permute.xlu2 %389  ;;  %v351_v51 = vmul.f32 %v875_v45, %v335_v30  ;;  %v211_v53 = vsel %vm210_vm13, %v873_v28, %v207_v44  ;;  %vm356_vm15 = vweird.f32 %v875_v45 }
 0x2a9   :  { %v222_v40 = vpop.permute.xlu1 %221  ;;  %v395_v55 = vsel %vm226_vm2, %v390_v38, 0  ;;  %v216_v56 = vsel %vm213_vm14, %v215_v54, %v211_v53  ;;  %vm357_vm4 = vmor %vm355_vm3, %vm356_vm15 }
 0x2aa   :  { %v228_v42 = vsel %vm226_vm2, %v222_v40, 0  ;;  %v352_v57 = vsub.f32 1.0, %v351_v51  ;;  %v218_v58 = vmul.f32 %v1101_v63, %v216_v56 }
 0x2ab   :  { %237 = vmatpush.bf16.msra.mxu3 %v228_v42 }
 0x2ac   :  { %v353_v59 = vmul.f32 %v875_v45, %v352_v57  ;;  %v220_v61 = vpack.c.bf16 %v218_v58, %v218_v58 }
 0x2ae   :  { %819 = vmatmul.msk.bf16.vlgmr.msra.gmra.mxu3 %vm127_vm1, %v219_v43  ;;  %v354_v62 = vadd.f32 %v875_v45, %v353_v59 }
 0x2af   :  { %827 = vmatmul.msk.bf16.vlgmr.msra.gmra.mxu2 %vm127_vm1, %v453_v32 }
 0x2b0   :  { %v549_v48 = vpop.permute.xlu2 %548  ;;  %v358_v4 = vsel %vm357_vm4, %v875_v45, %v354_v62 }
 0x2b1   :  { %v554_v49 = vsel %vm226_vm2, %v549_v48, 0  ;;  %v244_v50 = vpop.permute.xlu1 %243  ;;  %v363_v6 = vsel %vm360_vm5, %v362_v5, %v358_v4 }
 0x2b2   :  { %563 = vmatpush.bf16.msrb.mxu0 %v554_v49  ;;  %v249_v52 = vsel %vm226_vm2, %v244_v50, 0  ;;  %v365_v63 = vmul.f32 %v1105_v2, %v363_v6 }
 0x2b3   :  { %258 = vmatpush.bf16.msrb.mxu3 %v249_v52 }
 0x2b4   :  { %v367_v7 = vpack.c.bf16 %v365_v63, %v365_v63 }
 0x2b7   :  { %404 = vmatpush.bf16.msra.mxu3 %v395_v55 }
 0x2b8   :  { %v640_v22 = vpop.permute.xlu2 %639 }
 0x2b9   :  { %v478_v60 = vpop.permute.xlu1 %477  ;;  %v645_v25 = vsel %vm127_vm1, %v640_v22, 0 }
 0x2ba   :  { %v483_v0 = vsel %vm127_vm1, %v478_v60, 0 }
 0x2be   :  { %820 = vmatmul.msk.bf16.vlgmr.msrb.gmra.mxu3 %vm127_vm1, %v220_v61 }
 0x2bf   :  { %492 = vmatpush.bf16.xpose.msrb.mxu3 %v483_v0 }
 0x2c0   :  { %v615_v55 = vpop.permute.xlu2 %614 }
 0x2c1   :  { %v476_v8 = vpop.permute.xlu1 %475 }
 0x2c8   :  { %v638_v56 = vpop.permute.xlu2 %637 }
 0x2ce   :  { %824 = vmatmul.msk.bf16.vlgmr.msra.gmra.mxu3 %vm127_vm1, %v367_v7 }
 0x2de   :  { %828 = vmatmul.msk.bf16.vlgmr.msrb.gmra.mxu3 %vm127_vm1, %v476_v8 }
 0x322   :  { %v385_v12 = vpop.f32.mrf.mxu2 }
 0x32a   :  { %v387_v13 = vpop.f32.mrf.mxu2 }
 0x331   :  { %v239_v14 = vpop.f32.mrf.mxu3 }
 0x332   :  { %v471_v15 = vpop.f32.mrf.mxu2 }
 0x333   :  { %v498_v16 = vsel %vm127_vm1, %v471_v15, -inf }
 0x334   :  { %499 = vmax.xlane.f32.xlu1 %v498_v16 }
 0x339   :  { %v241_v17 = vpop.f32.mrf.mxu3 }
 0x33a   :  { %v473_v19 = vpop.f32.mrf.mxu2 }
 0x341   :  { %v260_v2 = vpop.f32.mrf.mxu3 }
 0x342   :  { %v264_v20 = vpack.c.bf16 %v260_v2, %v239_v14 }
 0x344   :  { %826 = vmatmul.msk.bf16.vlgmr.msra.gmra.mxu1 %vm127_vm1, %v264_v20 }
 0x349   :  { %v262_v21 = vpop.f32.mrf.mxu3 }
 0x34d   :  { %569 = vrot.lane.b32.xlu1 %v1065_v18, %s1005_s14 }
 0x351   :  { %v406_v23 = vpop.f32.mrf.mxu3 }
 0x352   :  { %v410_v24 = vpack.c.bf16 %v406_v23, %v385_v12 }
 0x354   :  { %825 = vmatmul.msk.bf16.vlgmr.msra.gmra.mxu0 %vm127_vm1, %v410_v24 }
 0x355   :  { %654 = vmatpush.bf16.xpose.msra.mxu0 %v645_v25 }
 0x359   :  { %v408_v26 = vpop.f32.mrf.mxu3 }
 0x361   :  { %v494_v27 = vpop.f32.mrf.mxu3 }
 0x362   :  { %v501_v39 = vsel %vm127_vm1, %v494_v27, -inf }
 0x369   :  { %v496_v28 = vpop.f32.mrf.mxu3 }
 0x3a7   :  { %v500_v29 = vpop.xlane.xlu1 %499 }
 0x3a8   :  { %v504_v30 = vsub.f32 %v471_v15, %v500_v29 }
 0x3aa   :  { %v506_v31 = vmul.f32 1.442695, %v504_v30 }
 0x3ac   :  { %876 = vpow2.f32 %v506_v31 }
 0x3b2   :  { %v877_v32 = vpop.eup %876 }
 0x3b3   :  { %v510_v33 = vsel %vm127_vm1, %v877_v32, 0.0 }
 0x3b4   :  { %511 = vadd.xlane.f32.xlu0 %v510_v33 }
 0x3bf   :  { %v570_v34 = vpop.permute.xlu1 %569 }
 0x3c0   :  { %v575_v35 = vsel %vm226_vm2, %v570_v34, 0 }
 0x3c1   :  { %584 = vmatpush.bf16.msrb.mxu1 %v575_v35  ;;  %v447_v36 = vpop.f32.mrf.mxu1 }
 0x3c8   :  { %616 = vrot.lane.b32.xlu0 %v1061_v10, %s1006_s15 }
 0x3c9   :  { %v1170_v34 = vpop.f32.mrf.mxu1 }
 0x3d1   :  { %v427_v37 = vpop.f32.mrf.mxu0 }
 0x3d2   :  { %v1152_v38 = vadd.f32 %v447_v36, %v427_v37 }
 0x3d9   :  { %v1160_v62 = vpop.f32.mrf.mxu0 }
 0x3f2   :  { %502 = vmax.xlane.f32.xlu0 %v501_v39 }
 0x427   :  { %v512_v40 = vpop.xlane.xlu0 %511 }
 0x428   :  { %878 = vrcp.f32 %v512_v40  ;;  %v527_v44 = vand.u32 2147483648, %v512_v40  ;;  %v525_v46 = vand.u32 2147483647, %v512_v40  ;;  %vm521_vm7 = vweird.f32 %v512_v40 }
 0x42a   :  { %v528_v48 = vor.u32 1.1754944e-38, %v527_v44  ;;  %vm526_vm9 = vcmp.eq.f32.partialorder %v525_v46, 8.507059e+37 }
 0x42e   :  { %v879_v41 = vpop.eup %878 }
 0x42f   :  { %v517_v42 = vmul.f32 %v879_v41, %v512_v40  ;;  %vm522_vm6 = vweird.f32 %v879_v41 }
 0x430   :  { %vm523_vm8 = vmor %vm521_vm7, %vm522_vm6 }
 0x431   :  { %v518_v43 = vsub.f32 1.0, %v517_v42 }
 0x433   :  { %v519_v45 = vmul.f32 %v879_v41, %v518_v43 }
 0x435   :  { %v520_v47 = vadd.f32 %v879_v41, %v519_v45 }
 0x437   :  { %v524_v49 = vsel %vm523_vm8, %v879_v41, %v520_v47 }
 0x438   :  { %v529_v50 = vsel %vm526_vm9, %v528_v48, %v524_v49 }
 0x439   :  { %v544_v51 = vmul.f32 %v877_v32, %v529_v50  ;;  %v591_v32 = vld [vmem:[#allocation7 + $0x8] sm:$0xf] }
 0x43a   :  { %v617_v52 = vpop.permute.xlu0 %616  ;;  %v596_v33 = vsel %vm226_vm2, %v591_v32, 0 }
 0x43b   :  { %v622_v53 = vsel %vm127_vm1, %v617_v52, 0  ;;  %v546_v54 = vpack.c.bf16 %v544_v51, %v544_v51  ;;  %605 = vmatpush.bf16.msrb.mxu2 %v596_v33 }
 0x43c   :  { %631 = vmatpush.bf16.xpose.msra.mxu3 %v622_v53 }
 0x43d   :  { %829 = vmatmul.msk.bf16.vlgmr.msrb.gmra.mxu0 %vm127_vm1, %v546_v54 }
 0x443   :  { %832 = vmatmul.msk.bf16.vlgmr.msra.gmra.mxu3 %vm127_vm1, %v615_v55 }
 0x44d   :  { %833 = vmatmul.msk.bf16.vlgmr.msra.gmra.mxu0 %vm127_vm1, %v638_v56 }
 0x465   :  { %v503_v57 = vpop.xlane.xlu0 %502 }
 0x466   :  { %v505_v58 = vsub.f32 %v494_v27, %v503_v57 }
 0x468   :  { %v508_v59 = vmul.f32 1.442695, %v505_v58 }
 0x46a   :  { %880 = vpow2.f32 %v508_v59 }
 0x470   :  { %v881_v60 = vpop.eup %880 }
 0x471   :  { %v513_v61 = vsel %vm127_vm1, %v881_v60, 0.0 }
 0x472   :  { %514 = vadd.xlane.f32.xlu2 %v513_v61 }
 0x4ba   :  { %v565_v0 = vpop.f32.mrf.mxu0 }
 0x4c2   :  { %v567_v1 = vpop.f32.mrf.mxu0 }
 0x4c6   :  { %v633_v3 = vpop.f32.mrf.mxu3 }
 0x4c7   :  { %v660_v4 = vsel %vm127_vm1, %v633_v3, -inf }
 0x4c8   :  { %661 = vmax.xlane.f32.xlu0 %v660_v4 }
 0x4ca   :  { %v656_v5 = vpop.f32.mrf.mxu0 }
 0x4cb   :  { %v663_v6 = vsel %vm127_vm1, %v656_v5, -inf }
 0x4cc   :  { %664 = vmax.xlane.f32.xlu1 %v663_v6 }
 0x4ce   :  { %v635_v63 = vpop.f32.mrf.mxu3 }
 0x4d2   :  { %v658_v7 = vpop.f32.mrf.mxu0 }
 0x4d3   :  { %v753_v7 = vld [vmem:[#allocation7 + $0xc] sm:$0xf] }
 0x4e5   :  { %v515_v8 = vpop.xlane.xlu2 %514 }
 0x4e6   :  { %882 = vrcp.f32 %v515_v8  ;;  %v541_v13 = vand.u32 2147483648, %v515_v8  ;;  %v539_v15 = vand.u32 2147483647, %v515_v8  ;;  %vm535_vm11 = vweird.f32 %v515_v8 }
 0x4e8   :  { %v542_v17 = vor.u32 1.1754944e-38, %v541_v13  ;;  %vm540_vm13 = vcmp.eq.f32.partialorder %v539_v15, 8.507059e+37 }
 0x4ec   :  { %v883_v9 = vpop.eup %882 }
 0x4ed   :  { %v531_v11 = vmul.f32 %v883_v9, %v515_v8  ;;  %vm536_vm10 = vweird.f32 %v883_v9  ;;  %v758_v8 = vsel %vm226_vm2, %v753_v7, 0 }
 0x4ee   :  { %vm537_vm12 = vmor %vm535_vm11, %vm536_vm10  ;;  %767 = vmatpush.bf16.msrb.mxu3 %v758_v8 }
 0x4ef   :  { %v532_v12 = vsub.f32 1.0, %v531_v11 }
 0x4f1   :  { %v533_v14 = vmul.f32 %v883_v9, %v532_v12 }
 0x4f3   :  { %v534_v16 = vadd.f32 %v883_v9, %v533_v14 }
 0x4f5   :  { %v538_v19 = vsel %vm537_vm12, %v883_v9, %v534_v16  ;;  %v859_v16 = vld [vmem:[%s1194_s4] ss:$0 sm:$0xff]  ;;  %s1010_s4 = smov 128  }
 0x4f6   :  { %v543_v2 = vsel %vm540_vm13, %v542_v17, %v538_v19 }
 0x4f7   :  { %v545_v20 = vmul.f32 %v881_v60, %v543_v2 }
 0x4f9   :  { %v547_v21 = vpack.c.bf16 %v545_v20, %v545_v20 }
 0x4fb   :  { %830 = vmatmul.msk.bf16.vlgmr.msrb.gmra.mxu1 %vm127_vm1, %v547_v21 }
 0x53b   :  { %v662_v22 = vpop.xlane.xlu0 %661 }
 0x53c   :  { %v666_v23 = vsub.f32 %v633_v3, %v662_v22 }
 0x53e   :  { %v668_v24 = vmul.f32 1.442695, %v666_v23 }
 0x53f   :  { %v665_v25 = vpop.xlane.xlu1 %664 }
 0x540   :  { %884 = vpow2.f32 %v668_v24  ;;  %v667_v26 = vsub.f32 %v656_v5, %v665_v25 }
 0x542   :  { %v670_v27 = vmul.f32 1.442695, %v667_v26 }
 0x544   :  { %886 = vpow2.f32 %v670_v27 }
 0x546   :  { %v885_v28 = vpop.eup %884 }
 0x547   :  { %v672_v29 = vsel %vm127_vm1, %v885_v28, 0.0 }
 0x548   :  { %673 = vadd.xlane.f32.xlu0 %v672_v29 }
 0x54a   :  { %v887_v30 = vpop.eup %886 }
 0x54b   :  { %v675_v31 = vsel %vm127_vm1, %v887_v30, 0.0 }
 0x54c   :  { %676 = vadd.xlane.f32.xlu2 %v675_v31 }
 0x55c   :  { %710 = vrot.lane.b32.xlu0 %v1061_v10, %s1008_s17 }
 0x564   :  { %731 = vrot.lane.b32.xlu2 %v1065_v18, %s1008_s17 }
 0x578   :  { %v586_v35 = vpop.f32.mrf.mxu1 }
 0x579   :  { %v590_v36 = vpack.c.bf16 %v586_v35, %v565_v0 }
 0x57b   :  { %831 = vmatmul.msk.bf16.vlgmr.msrb.gmra.mxu2 %vm127_vm1, %v590_v36 }
 0x580   :  { %v588_v37 = vpop.f32.mrf.mxu1 }
 0x5bb   :  { %v674_v39 = vpop.xlane.xlu0 %673 }
 0x5bc   :  { %888 = vrcp.f32 %v674_v39  ;;  %v687_v45 = vand.u32 2147483647, %v674_v39  ;;  %v689_v46 = vand.u32 2147483648, %v674_v39  ;;  %vm683_vm15 = vweird.f32 %v674_v39 }
 0x5be   :  { %vm688_vm4 = vcmp.eq.f32.partialorder %v687_v45, 8.507059e+37  ;;  %v690_v51 = vor.u32 1.1754944e-38, %v689_v46 }
 0x5bf   :  { %v677_v40 = vpop.xlane.xlu2 %676 }
 0x5c0   :  { %890 = vrcp.f32 %v677_v40  ;;  %v703_v52 = vand.u32 2147483648, %v677_v40  ;;  %v701_v55 = vand.u32 2147483647, %v677_v40  ;;  %vm697_vm6 = vweird.f32 %v677_v40 }
 0x5c2   :  { %v889_v41 = vpop.eup %888  ;;  %v704_v59 = vor.u32 1.1754944e-38, %v703_v52  ;;  %vm702_vm8 = vcmp.eq.f32.partialorder %v701_v55, 8.507059e+37 }
 0x5c3   :  { %v679_v42 = vmul.f32 %v889_v41, %v674_v39  ;;  %vm684_vm14 = vweird.f32 %v889_v41 }
 0x5c4   :  { %vm685_vm3 = vmor %vm683_vm15, %vm684_vm14 }
 0x5c5   :  { %v680_v43 = vsub.f32 1.0, %v679_v42 }
 0x5c6   :  { %v891_v44 = vpop.eup %890 }
 0x5c7   :  { %v681_v10 = vmul.f32 %v889_v41, %v680_v43  ;;  %v693_v18 = vmul.f32 %v891_v44, %v677_v40  ;;  %v732_v47 = vpop.permute.xlu2 %731  ;;  %vm698_vm5 = vweird.f32 %v891_v44 }
 0x5c8   :  { %v737_v48 = vsel %vm226_vm2, %v732_v47, 0  ;;  %vm699_vm7 = vmor %vm697_vm6, %vm698_vm5 }
 0x5c9   :  { %v682_v49 = vadd.f32 %v889_v41, %v681_v10  ;;  %v694_v50 = vsub.f32 1.0, %v693_v18  ;;  %746 = vmatpush.bf16.msra.mxu2 %v737_v48 }
 0x5cb   :  { %v686_v53 = vsel %vm685_vm3, %v889_v41, %v682_v49  ;;  %v695_v54 = vmul.f32 %v891_v44, %v694_v50 }
 0x5cc   :  { %v691_v56 = vsel %vm688_vm4, %v690_v51, %v686_v53 }
 0x5cd   :  { %v706_v57 = vmul.f32 %v885_v28, %v691_v56  ;;  %v696_v58 = vadd.f32 %v891_v44, %v695_v54 }
 0x5ce   :  { %v711_v60 = vpop.permute.xlu0 %710 }
 0x5cf   :  { %v700_v61 = vsel %vm699_vm7, %v891_v44, %v696_v58  ;;  %v716_v0 = vsel %vm226_vm2, %v711_v60, 0  ;;  %v708_v4 = vpack.c.bf16 %v706_v57, %v706_v57 }
 0x5d0   :  { %v705_v1 = vsel %vm702_vm8, %v704_v59, %v700_v61  ;;  %725 = vmatpush.bf16.msra.mxu1 %v716_v0 }
 0x5d1   :  { %v707_v3 = vmul.f32 %v887_v30, %v705_v1 }
 0x5d3   :  { %834 = vmatmul.msk.bf16.vlgmr.msra.gmra.mxu1 %vm127_vm1, %v708_v4  ;;  %v709_v5 = vpack.c.bf16 %v707_v3, %v707_v3 }
 0x5d5   :  { %835 = vmatmul.msk.bf16.vlgmr.msra.gmra.mxu2 %vm127_vm1, %v709_v5 }
 0x5fe   :  { %v607_v6 = vpop.f32.mrf.mxu2 }
 0x5ff   :  { %v612_v63 = vadd.f32 %v607_v6, %v1152_v38  ;;  %v450_v38 = vadd.f32 %v1170_v34, %v1160_v62 }
 0x606   :  { %v609_v9 = vpop.f32.mrf.mxu2 }
 0x607   :  { %v613_v20 = vadd.f32 %v609_v9, %v450_v38 }
 0x650   :  { %v727_v11 = vpop.f32.mrf.mxu1 }
 0x658   :  { %v729_v12 = vpop.f32.mrf.mxu1  ;;  %v748_v13 = vpop.f32.mrf.mxu2 }
 0x659   :  { %v752_v14 = vpack.c.bf16 %v748_v13, %v727_v11 }
 0x65b   :  { %836 = vmatmul.msk.bf16.vlgmr.msrb.gmra.mxu3 %vm127_vm1, %v752_v14 }
 0x660   :  { %v750_v15 = vpop.f32.mrf.mxu2 }
 0x6de   :  { %v769_v17 = vpop.f32.mrf.mxu3 }
 0x6df   :  { %v774_v19 = vadd.f32 %v769_v17, %v612_v63 }
 0x6e1   :  { %v780_v2 = vadd.f32 %v859_v16, %v774_v19 }
 0x6e3   :  { %782 = vst.msk [vmem:[#allocation8] sm:$0xff] %vm92_vm0, %v780_v2 }
 0x6e6   :  { %v771_v21 = vpop.f32.mrf.mxu3 }
 0x6e7   :  { %v775_v22 = vadd.f32 %v771_v21, %v613_v20 }
 0x6e9   :  { %v781_v23 = vadd.f32 %v859_v16, %v775_v22 }
 0x6eb   :  { %783 = vst.msk [vmem:[#allocation8 + $0x8] sm:$0xff] %vm92_vm0, %v781_v23 }
 0x6ec   :  { %796 = dma.vmem_to_hbm [thread:$0]  %s789_s21, 256, %s791_s24, [#allocation4], %s1010_s4, %s1010_s4, %s1011_s25  }
 0x6ed   :  { %992 = dma.done.wait [#allocation4], 256  }
 0x6ee   :  { %993 = vsyncadd [#allocation4], 4294967040 }
 0x6ef   :  { %801 = vsyncpa [#allocation3], 1 }
 0x6f0   :  { %802 = vsyncpa [#allocation6], 1 }
 0x6f1   :  { %803 = vsyncpa [#allocation4], 1 }

// kernel: tpu_custom_call.1
= control target key start
LH: loop header
LB: loop body
LE: loop exit
PB: predicated region body
PF: predicated region fallthrough
CT: control target
= control target key end

     0   :  { %10 = vsyncpa [#allocation3], 0  ;;  %s1190_s0 = inlined_call_operand.hbm [shape: bf16[2,8,32], index: 0, kind: input, shape index: {}]   ;;  %s1191_s1 = inlined_call_operand.hbm [shape: bf16[32,96], index: 1, kind: input, shape index: {}]   ;;  %s1192_s2 = inlined_call_operand.vmem [shape: f32[1,96], index: 2, kind: input, shape index: {}]   ;;  %s1193_s3 = inlined_call_operand.hbm [shape: bf16[32,32], index: 3, kind: input, shape index: {}]   ;;  %s1194_s4 = inlined_call_operand.vmem [shape: f32[1,32], index: 4, kind: input, shape index: {}]   ;;  %s1195_s5 = inlined_call_operand.hbm [shape: f32[2,8,32], index: 5, kind: output, shape index: {}]  }
   0x1   :  { %11 = vsyncpa [#allocation6], 0 }
   0x2   :  { %12 = vsyncpa [#allocation4], 0  ;;  %s30_s20 = sshll.u32 %s1191_s1, 4  ;;  %s994_s21 = smov [#allocation5]   ;;  %s31_s20 = int_to_ptr.hbm [resolvable:$true] %s30_s20 }
   0x3   :  { %s32_s22 = sshll.u32 %s994_s21, 4  ;;  %s17_s25 = sshll.u32 %s1190_s0, 4  ;;  %s33_s22 = int_to_ptr.vmem [resolvable:$true] %s32_s22  ;;  %s18_s25 = int_to_ptr.hbm [resolvable:$true] %s17_s25 }
   0x4   :  { %s995_s26 = smov 64   ;;  %s996_s27 = smov 4  }
   0x5   :  { %38 = dma.hbm_to_vmem [thread:$0]  %s31_s20, 256, %s33_s22, [#allocation6], %s995_s26, %s995_s26, %s996_s27  }
   0x6   :  { %s997_s28 = smov [#allocation2]   ;;  %s45_s1 = sshll.u32 %s1193_s3, 4  ;;  %s46_s1 = int_to_ptr.hbm [resolvable:$true] %s45_s1 }
   0x7   :  { %s19_s29 = sshll.u32 %s997_s28, 4  ;;  %s998_s7 = smov [#allocation7]   ;;  %s20_s29 = int_to_ptr.vmem [resolvable:$true] %s19_s29 }
   0x8   :  { %25 = dma.hbm_to_vmem [thread:$0]  %s18_s25, 128, %s20_s29, [#allocation3], %s995_s26, %s995_s26, %s996_s27  }
   0x9   :  { %s47_s8 = sshll.u32 %s998_s7, 4  ;;  %s48_s8 = int_to_ptr.vmem [resolvable:$true] %s47_s8 }
   0xa   :  { %53 = dma.hbm_to_vmem [thread:$0]  %s46_s1, 256, %s48_s8, [#allocation6], %s995_s26, %s995_s26, %s996_s27  }
   0xb   :  { %988 = dma.done.wait [#allocation3], 128  }
   0xc   :  { %989 = vsyncadd [#allocation3], 4294967168 }
   0xd   :  { %990 = dma.done.wait [#allocation6], 512  }
   0xe   :  { %991 = vsyncadd [#allocation6], 4294966784  ;;  %v839_v0 = vld [vmem:[#allocation5 + $0x8] sm:$0xff]  ;;  %v838_v1 = vld [vmem:[#allocation5] sm:$0xff]  ;;  %vm92_vm0 = vcmask 261120   ;;  %s999_s9 = smov 96  }
   0xf   :  { %102 = vmatpush.bf16.msra.mxu0 %v839_v0  ;;  %v837_v2 = vld [vmem:[#allocation2] sm:$0xff]  ;;  %s1000_s10 = smov 88   ;;  %s1002_s11 = smov 56   ;;  %vm127_vm1 = vcmask 64512   ;;  %vm226_vm2 = vcmask 1043456  }
  0x10   :  { %v858_v3 = vld [vmem:[%s1192_s2] ss:$0 sm:$0xff]  ;;  %s1001_s2 = smov 120   ;;  %s1003_s12 = smov 80  }
  0x11   :  { %s1004_s13 = smov 112   ;;  %s1005_s14 = smov 48  }
  0x12   :  { %s1006_s15 = smov 72   ;;  %s1007_s16 = smov 104  }
  0x13   :  { %103 = vmatpush.bf16.msra.mxu0 %v838_v1  ;;  %s1008_s17 = smov 40   ;;  %s1009_s20 = smov [#allocation8]  }
  0x14   :  { %s788_s21 = sshll.u32 %s1009_s20, 4  ;;  %s790_s24 = sshll.u32 %s1195_s5, 4  ;;  %s789_s21 = int_to_ptr.vmem [resolvable:$true] %s788_s21  ;;  %s791_s24 = int_to_ptr.hbm [resolvable:$true] %s790_s24 }
  0x15   :  { %s1011_s25 = smov 8  }
  0x16   :  { %816 = vmatmul.msk.bf16.vlgmr.msra.gmra.mxu0 %vm92_vm0, %v837_v2 }
  0x93   :  { %v105_v4 = vpop.f32.mrf.mxu0 }
  0x94   :  { %v114_v5 = vadd.f32 %v858_v3, %v105_v4 }
  0x96   :  { %v116_v6 = vmul.f32 0.35355338, %v114_v5  ;;  %v120_v7 = vpack.c.bf16 %v114_v5, %v114_v5 }
  0x98   :  { %v123_v8 = vunpack.c.l.b16 %v120_v7  ;;  %v118_v9 = vpack.c.bf16 %v116_v6, %v116_v6  ;;  %v411_v6 = vld [vmem:[#allocation7 + $0x4] sm:$0xf] }
  0x9a   :  { %v1061_v10 = vpack.c.b16 %v123_v8, %v123_v8  ;;  %v267_v15 = vunpack.c.l.b16 %v118_v9  ;;  %v416_v8 = vsel %vm226_vm2, %v411_v6, 0 }
  0x9b   :  { %v107_v11 = vpop.f32.mrf.mxu0 }
  0x9c   :  { %v115_v12 = vadd.f32 %v858_v3, %v107_v11  ;;  %125 = vrot.lane.b32.xlu1 %v1061_v10, %s999_s9  ;;  %271 = vrot.lane.b32.xlu0 %v1061_v10, %s1000_s10  ;;  %v1067_v19 = vpack.c.b16 %v267_v15, %v267_v15 }
  0x9e   :  { %v117_v13 = vmul.f32 0.35355338, %v115_v12  ;;  %v121_v14 = vpack.c.bf16 %v115_v12, %v115_v12 }
  0xa0   :  { %v148_v16 = vunpack.c.l.b16 %v121_v14  ;;  %v119_v17 = vpack.c.bf16 %v117_v13, %v117_v13 }
  0xa2   :  { %v1065_v18 = vpack.c.b16 %v148_v16, %v148_v16  ;;  %v293_v20 = vunpack.c.l.b16 %v119_v17 }
  0xa4   :  { %269 = vrot.lane.b32.xlu0 %v1067_v19, %s1001_s2  ;;  %297 = vrot.lane.b32.xlu2 %v1065_v18, %s1000_s10  ;;  %v1072_v21 = vpack.c.b16 %v293_v20, %v293_v20 }
  0xa5   :  { %150 = vrot.lane.b32.xlu1 %v1065_v18, %s999_s9 }
  0xac   :  { %295 = vrot.lane.b32.xlu2 %v1072_v21, %s1001_s2 }
  0xb4   :  { %368 = vrot.lane.b32.xlu2 %v1061_v10, %s1002_s11 }
  0xfe   :  { %v298_v22 = vpop.permute.xlu2 %297 }
  0xff   :  { %v303_v28 = vsel %vm127_vm1, %v298_v22, 0 }
 0x106   :  { %v296_v23 = vpop.permute.xlu2 %295 }
 0x10e   :  { %v126_v24 = vpop.permute.xlu1 %125  ;;  %v272_v25 = vpop.permute.xlu0 %271 }
 0x10f   :  { %v132_v26 = vsel %vm127_vm1, %v126_v24, 0  ;;  %v277_v27 = vsel %vm127_vm1, %v272_v25, 0  ;;  %v369_v29 = vpop.permute.xlu2 %368 }
 0x110   :  { %141 = vmatpush.bf16.xpose.msra.mxu1 %v132_v26  ;;  %286 = vmatpush.bf16.xpose.msrb.mxu0 %v277_v27  ;;  %v374_v33 = vsel %vm226_vm2, %v369_v29, 0 }
 0x116   :  { %v270_v30 = vpop.permute.xlu0 %269 }
 0x117   :  { %v151_v31 = vpop.permute.xlu1 %150  ;;  %817 = vmatmul.msk.bf16.vlgmr.msra.gmra.mxu1 %vm127_vm1, %v118_v9  ;;  %821 = vmatmul.msk.bf16.vlgmr.msrb.gmra.mxu0 %vm127_vm1, %v270_v30 }
 0x118   :  { %312 = vmatpush.bf16.xpose.msrb.mxu1 %v303_v28  ;;  %v156_v32 = vsel %vm127_vm1, %v151_v31, 0  ;;  %425 = vmatpush.bf16.msra.mxu0 %v416_v8 }
 0x119   :  { %165 = vmatpush.bf16.xpose.msra.mxu2 %v156_v32 }
 0x120   :  { %818 = vmatmul.msk.bf16.vlgmr.msra.gmra.mxu2 %vm127_vm1, %v119_v17 }
 0x121   :  { %383 = vmatpush.bf16.msrb.mxu2 %v374_v33 }
 0x127   :  { %822 = vmatmul.msk.bf16.vlgmr.msrb.gmra.mxu1 %vm127_vm1, %v296_v23 }
 0x194   :  { %v143_v34 = vpop.f32.mrf.mxu1  ;;  %v288_v35 = vpop.f32.mrf.mxu0 }
 0x195   :  { %v318_v36 = vsel %vm127_vm1, %v288_v35, -inf  ;;  %v171_v37 = vsel %vm127_vm1, %v143_v34, -inf }
 0x196   :  { %319 = vmax.xlane.f32.xlu0 %v318_v36  ;;  %172 = vmax.xlane.f32.xlu2 %v171_v37 }
 0x19c   :  { %v145_v38 = vpop.f32.mrf.mxu1  ;;  %v290_v39 = vpop.f32.mrf.mxu0 }
 0x1a3   :  { %v167_v40 = vpop.f32.mrf.mxu2 }
 0x1a4   :  { %v314_v41 = vpop.f32.mrf.mxu1  ;;  %v174_v42 = vsel %vm127_vm1, %v167_v40, -inf }
 0x1a5   :  { %175 = vmax.xlane.f32.xlu2 %v174_v42  ;;  %v321_v45 = vsel %vm127_vm1, %v314_v41, -inf }
 0x1aa   :  { %454 = vrot.lane.b32.xlu0 %v1061_v10, %s1003_s12 }
 0x1ab   :  { %v169_v43 = vpop.f32.mrf.mxu2 }
 0x1ac   :  { %v316_v44 = vpop.f32.mrf.mxu1 }
 0x1ad   :  { %322 = vmax.xlane.f32.xlu2 %v321_v45 }
 0x209   :  { %v320_v46 = vpop.xlane.xlu0 %319  ;;  %v173_v47 = vpop.xlane.xlu2 %172 }
 0x20a   :  { %v324_v48 = vsub.f32 %v288_v35, %v320_v46  ;;  %v177_v49 = vsub.f32 %v143_v34, %v173_v47 }
 0x20c   :  { %v326_v50 = vmul.f32 1.442695, %v324_v48  ;;  %v179_v51 = vmul.f32 1.442695, %v177_v49 }
 0x20e   :  { %860 = vpow2.f32 %v326_v50 }
 0x20f   :  { %862 = vpow2.f32 %v179_v51 }
 0x214   :  { %v1092_v52 = vpop.eup %860 }
 0x215   :  { %v1094_v53 = vpop.eup %862  ;;  %v330_v54 = vsel %vm127_vm1, %v1092_v52, 0.0 }
 0x216   :  { %331 = vadd.xlane.f32.xlu1 %v330_v54  ;;  %v183_v55 = vsel %vm127_vm1, %v1094_v53, 0.0 }
 0x217   :  { %184 = vadd.xlane.f32.xlu0 %v183_v55 }
 0x218   :  { %v176_v56 = vpop.xlane.xlu2 %175 }
 0x219   :  { %v178_v57 = vsub.f32 %v167_v40, %v176_v56 }
 0x21b   :  { %v181_v58 = vmul.f32 1.442695, %v178_v57 }
 0x21c   :  { %v455_v59 = vpop.permute.xlu0 %454 }
 0x21d   :  { %864 = vpow2.f32 %v181_v58  ;;  %v460_v60 = vsel %vm127_vm1, %v455_v59, 0 }
 0x21e   :  { %469 = vmatpush.bf16.xpose.msra.mxu2 %v460_v60 }
 0x220   :  { %v323_v61 = vpop.xlane.xlu2 %322 }
 0x221   :  { %v325_v62 = vsub.f32 %v314_v41, %v323_v61 }
 0x223   :  { %v1101_v63 = vpop.eup %864  ;;  %v328_v0 = vmul.f32 1.442695, %v325_v62 }
 0x224   :  { %v186_v1 = vsel %vm127_vm1, %v1101_v63, 0.0 }
 0x225   :  { %866 = vpow2.f32 %v328_v0  ;;  %187 = vadd.xlane.f32.xlu2 %v186_v1 }
 0x22b   :  { %v1105_v2 = vpop.eup %866 }
 0x22c   :  { %v333_v3 = vsel %vm127_vm1, %v1105_v2, 0.0 }
 0x22d   :  { %334 = vadd.xlane.f32.xlu2 %v333_v3 }
 0x22f   :  { %452 = vrot.lane.b32.xlu1 %v1067_v19, %s1004_s13 }
 0x237   :  { %221 = vrot.lane.b32.xlu1 %v1061_v10, %s995_s26 }
 0x23f   :  { %243 = vrot.lane.b32.xlu1 %v1065_v18, %s995_s26 }
 0x245   :  { %389 = vrot.lane.b32.xlu2 %v1065_v18, %s1002_s11 }
 0x247   :  { %477 = vrot.lane.b32.xlu1 %v1065_v18, %s1003_s12 }
 0x24d   :  { %548 = vrot.lane.b32.xlu2 %v1061_v10, %s1005_s14 }
 0x24f   :  { %475 = vrot.lane.b32.xlu1 %v1072_v21, %s1004_s13 }
 0x255   :  { %639 = vrot.lane.b32.xlu2 %v1065_v18, %s1006_s15 }
 0x25d   :  { %614 = vrot.lane.b32.xlu2 %v1067_v19, %s1007_s16 }
 0x265   :  { %637 = vrot.lane.b32.xlu2 %v1072_v21, %s1007_s16 }
 0x289   :  { %v332_v4 = vpop.xlane.xlu1 %331 }
 0x28a   :  { %868 = vrcp.f32 %v332_v4  ;;  %v185_v5 = vpop.xlane.xlu0 %184  ;;  %v347_v15 = vand.u32 2147483648, %v332_v4  ;;  %v345_v16 = vand.u32 2147483647, %v332_v4  ;;  %vm341_vm4 = vweird.f32 %v332_v4 }
 0x28b   :  { %870 = vrcp.f32 %v185_v5  ;;  %v200_v29 = vand.u32 2147483648, %v185_v5  ;;  %vm194_vm8 = vweird.f32 %v185_v5  ;;  %v198_v31 = vand.u32 2147483647, %v185_v5 }
 0x28c   :  { %v348_v21 = vor.u32 1.1754944e-38, %v347_v15  ;;  %vm346_vm6 = vcmp.eq.f32.partialorder %v345_v16, 8.507059e+37 }
 0x28d   :  { %v201_v35 = vor.u32 1.1754944e-38, %v200_v29  ;;  %vm199_vm10 = vcmp.eq.f32.partialorder %v198_v31, 8.507059e+37 }
 0x290   :  { %v869_v7 = vpop.eup %868 }
 0x291   :  { %v871_v9 = vpop.eup %870  ;;  %v337_v11 = vmul.f32 %v869_v7, %v332_v4  ;;  %vm342_vm3 = vweird.f32 %v869_v7 }
 0x292   :  { %v190_v12 = vmul.f32 %v871_v9, %v185_v5  ;;  %vm343_vm5 = vmor %vm341_vm4, %vm342_vm3  ;;  %vm195_vm7 = vweird.f32 %v871_v9 }
 0x293   :  { %v338_v13 = vsub.f32 1.0, %v337_v11  ;;  %vm196_vm9 = vmor %vm194_vm8, %vm195_vm7 }
 0x294   :  { %v191_v17 = vsub.f32 1.0, %v190_v12 }
 0x295   :  { %v339_v14 = vmul.f32 %v869_v7, %v338_v13 }
 0x296   :  { %v192_v22 = vmul.f32 %v871_v9, %v191_v17 }
 0x297   :  { %v340_v19 = vadd.f32 %v869_v7, %v339_v14 }
 0x298   :  { %v188_v20 = vpop.xlane.xlu2 %187  ;;  %v193_v27 = vadd.f32 %v871_v9, %v192_v22 }
 0x299   :  { %872 = vrcp.f32 %v188_v20  ;;  %v344_v23 = vsel %vm343_vm5, %v869_v7, %v340_v19  ;;  %v214_v46 = vand.u32 2147483648, %v188_v20  ;;  %vm208_vm12 = vweird.f32 %v188_v20 }
 0x29a   :  { %v349_v24 = vsel %vm346_vm6, %v348_v21, %v344_v23  ;;  %v197_v34 = vsel %vm196_vm9, %v871_v9, %v193_v27  ;;  %v212_v47 = vand.u32 2147483647, %v188_v20  ;;  %v265_v9 = vld [vmem:[#allocation7] sm:$0xf] }
 0x29b   :  { %v364_v25 = vmul.f32 %v1092_v52, %v349_v24  ;;  %v202_v36 = vsel %vm199_vm10, %v201_v35, %v197_v34  ;;  %v215_v54 = vor.u32 1.1754944e-38, %v214_v46  ;;  %v436_v11 = vsel %vm226_vm2, %v265_v9, 0 }
 0x29c   :  { %v217_v39 = vmul.f32 %v1094_v53, %v202_v36  ;;  %vm213_vm14 = vcmp.eq.f32.partialorder %v212_v47, 8.507059e+37  ;;  %445 = vmatpush.bf16.msra.mxu1 %v436_v11 }
 0x29d   :  { %v366_v26 = vpack.c.bf16 %v364_v25, %v364_v25 }
 0x29e   :  { %v219_v43 = vpack.c.bf16 %v217_v39, %v217_v39 }
 0x29f   :  { %v873_v28 = vpop.eup %872  ;;  %823 = vmatmul.msk.bf16.vlgmr.msrb.gmra.mxu2 %vm127_vm1, %v366_v26 }
 0x2a0   :  { %v335_v30 = vpop.xlane.xlu2 %334  ;;  %v204_v33 = vmul.f32 %v873_v28, %v188_v20  ;;  %vm209_vm11 = vweird.f32 %v873_v28 }
 0x2a1   :  { %v453_v32 = vpop.permute.xlu1 %452  ;;  %874 = vrcp.f32 %v335_v30  ;;  %vm210_vm13 = vmor %vm208_vm12, %vm209_vm11  ;;  %v361_v1 = vand.u32 2147483648, %v335_v30  ;;  %vm355_vm3 = vweird.f32 %v335_v30  ;;  %v359_v3 = vand.u32 2147483647, %v335_v30 }
 0x2a2   :  { %v205_v37 = vsub.f32 1.0, %v204_v33 }
 0x2a3   :  { %v362_v5 = vor.u32 1.1754944e-38, %v361_v1  ;;  %vm360_vm5 = vcmp.eq.f32.partialorder %v359_v3, 8.507059e+37 }
 0x2a4   :  { %v206_v41 = vmul.f32 %v873_v28, %v205_v37 }
 0x2a6   :  { %v207_v44 = vadd.f32 %v873_v28, %v206_v41 }
 0x2a7   :  { %v875_v45 = vpop.eup %874 }
 0x2a8   :  { %v390_v38 = vpop.permute.xlu2 %389  ;;  %v351_v51 = vmul.f32 %v875_v45, %v335_v30  ;;  %v211_v53 = vsel %vm210_vm13, %v873_v28, %v207_v44  ;;  %vm356_vm15 = vweird.f32 %v875_v45 }
 0x2a9   :  { %v222_v40 = vpop.permute.xlu1 %221  ;;  %v395_v55 = vsel %vm226_vm2, %v390_v38, 0  ;;  %v216_v56 = vsel %vm213_vm14, %v215_v54, %v211_v53  ;;  %vm357_vm4 = vmor %vm355_vm3, %vm356_vm15 }
 0x2aa   :  { %v228_v42 = vsel %vm226_vm2, %v222_v40, 0  ;;  %v352_v57 = vsub.f32 1.0, %v351_v51  ;;  %v218_v58 = vmul.f32 %v1101_v63, %v216_v56 }
 0x2ab   :  { %237 = vmatpush.bf16.msra.mxu3 %v228_v42 }
 0x2ac   :  { %v353_v59 = vmul.f32 %v875_v45, %v352_v57  ;;  %v220_v61 = vpack.c.bf16 %v218_v58, %v218_v58 }
 0x2ae   :  { %819 = vmatmul.msk.bf16.vlgmr.msra.gmra.mxu3 %vm127_vm1, %v219_v43  ;;  %v354_v62 = vadd.f32 %v875_v45, %v353_v59 }
 0x2af   :  { %827 = vmatmul.msk.bf16.vlgmr.msra.gmra.mxu2 %vm127_vm1, %v453_v32 }
 0x2b0   :  { %v549_v48 = vpop.permute.xlu2 %548  ;;  %v358_v4 = vsel %vm357_vm4, %v875_v45, %v354_v62 }
 0x2b1   :  { %v554_v49 = vsel %vm226_vm2, %v549_v48, 0  ;;  %v244_v50 = vpop.permute.xlu1 %243  ;;  %v363_v6 = vsel %vm360_vm5, %v362_v5, %v358_v4 }
 0x2b2   :  { %563 = vmatpush.bf16.msrb.mxu0 %v554_v49  ;;  %v249_v52 = vsel %vm226_vm2, %v244_v50, 0  ;;  %v365_v63 = vmul.f32 %v1105_v2, %v363_v6 }
 0x2b3   :  { %258 = vmatpush.bf16.msrb.mxu3 %v249_v52 }
 0x2b4   :  { %v367_v7 = vpack.c.bf16 %v365_v63, %v365_v63 }
 0x2b7   :  { %404 = vmatpush.bf16.msra.mxu3 %v395_v55 }
 0x2b8   :  { %v640_v22 = vpop.permute.xlu2 %639 }
 0x2b9   :  { %v478_v60 = vpop.permute.xlu1 %477  ;;  %v645_v25 = vsel %vm127_vm1, %v640_v22, 0 }
 0x2ba   :  { %v483_v0 = vsel %vm127_vm1, %v478_v60, 0 }
 0x2be   :  { %820 = vmatmul.msk.bf16.vlgmr.msrb.gmra.mxu3 %vm127_vm1, %v220_v61 }
 0x2bf   :  { %492 = vmatpush.bf16.xpose.msrb.mxu3 %v483_v0 }
 0x2c0   :  { %v615_v55 = vpop.permute.xlu2 %614 }
 0x2c1   :  { %v476_v8 = vpop.permute.xlu1 %475 }
 0x2c8   :  { %v638_v56 = vpop.permute.xlu2 %637 }
 0x2ce   :  { %824 = vmatmul.msk.bf16.vlgmr.msra.gmra.mxu3 %vm127_vm1, %v367_v7 }
 0x2de   :  { %828 = vmatmul.msk.bf16.vlgmr.msrb.gmra.mxu3 %vm127_vm1, %v476_v8 }
 0x322   :  { %v385_v12 = vpop.f32.mrf.mxu2 }
 0x32a   :  { %v387_v13 = vpop.f32.mrf.mxu2 }
 0x331   :  { %v239_v14 = vpop.f32.mrf.mxu3 }
 0x332   :  { %v471_v15 = vpop.f32.mrf.mxu2 }
 0x333   :  { %v498_v16 = vsel %vm127_vm1, %v471_v15, -inf }
 0x334   :  { %499 = vmax.xlane.f32.xlu1 %v498_v16 }
 0x339   :  { %v241_v17 = vpop.f32.mrf.mxu3 }
 0x33a   :  { %v473_v19 = vpop.f32.mrf.mxu2 }
 0x341   :  { %v260_v2 = vpop.f32.mrf.mxu3 }
 0x342   :  { %v264_v20 = vpack.c.bf16 %v260_v2, %v239_v14 }
 0x344   :  { %826 = vmatmul.msk.bf16.vlgmr.msra.gmra.mxu1 %vm127_vm1, %v264_v20 }
 0x349   :  { %v262_v21 = vpop.f32.mrf.mxu3 }
 0x34d   :  { %569 = vrot.lane.b32.xlu1 %v1065_v18, %s1005_s14 }
 0x351   :  { %v406_v23 = vpop.f32.mrf.mxu3 }
 0x352   :  { %v410_v24 = vpack.c.bf16 %v406_v23, %v385_v12 }
 0x354   :  { %825 = vmatmul.msk.bf16.vlgmr.msra.gmra.mxu0 %vm127_vm1, %v410_v24 }
 0x355   :  { %654 = vmatpush.bf16.xpose.msra.mxu0 %v645_v25 }
 0x359   :  { %v408_v26 = vpop.f32.mrf.mxu3 }
 0x361   :  { %v494_v27 = vpop.f32.mrf.mxu3 }
 0x362   :  { %v501_v39 = vsel %vm127_vm1, %v494_v27, -inf }
 0x369   :  { %v496_v28 = vpop.f32.mrf.mxu3 }
 0x3a7   :  { %v500_v29 = vpop.xlane.xlu1 %499 }
 0x3a8   :  { %v504_v30 = vsub.f32 %v471_v15, %v500_v29 }
 0x3aa   :  { %v506_v31 = vmul.f32 1.442695, %v504_v30 }
 0x3ac   :  { %876 = vpow2.f32 %v506_v31 }
 0x3b2   :  { %v877_v32 = vpop.eup %876 }
 0x3b3   :  { %v510_v33 = vsel %vm127_vm1, %v877_v32, 0.0 }
 0x3b4   :  { %511 = vadd.xlane.f32.xlu0 %v510_v33 }
 0x3bf   :  { %v570_v34 = vpop.permute.xlu1 %569 }
 0x3c0   :  { %v575_v35 = vsel %vm226_vm2, %v570_v34, 0 }
 0x3c1   :  { %584 = vmatpush.bf16.msrb.mxu1 %v575_v35  ;;  %v447_v36 = vpop.f32.mrf.mxu1 }
 0x3c8   :  { %616 = vrot.lane.b32.xlu0 %v1061_v10, %s1006_s15 }
 0x3c9   :  { %v1170_v34 = vpop.f32.mrf.mxu1 }
 0x3d1   :  { %v427_v37 = vpop.f32.mrf.mxu0 }
 0x3d2   :  { %v1152_v38 = vadd.f32 %v447_v36, %v427_v37 }
 0x3d9   :  { %v1160_v62 = vpop.f32.mrf.mxu0 }
 0x3f2   :  { %502 = vmax.xlane.f32.xlu0 %v501_v39 }
 0x427   :  { %v512_v40 = vpop.xlane.xlu0 %511 }
 0x428   :  { %878 = vrcp.f32 %v512_v40  ;;  %v527_v44 = vand.u32 2147483648, %v512_v40  ;;  %v525_v46 = vand.u32 2147483647, %v512_v40  ;;  %vm521_vm7 = vweird.f32 %v512_v40 }
 0x42a   :  { %v528_v48 = vor.u32 1.1754944e-38, %v527_v44  ;;  %vm526_vm9 = vcmp.eq.f32.partialorder %v525_v46, 8.507059e+37 }
 0x42e   :  { %v879_v41 = vpop.eup %878 }
 0x42f   :  { %v517_v42 = vmul.f32 %v879_v41, %v512_v40  ;;  %vm522_vm6 = vweird.f32 %v879_v41 }
 0x430   :  { %vm523_vm8 = vmor %vm521_vm7, %vm522_vm6 }
 0x431   :  { %v518_v43 = vsub.f32 1.0, %v517_v42 }
 0x433   :  { %v519_v45 = vmul.f32 %v879_v41, %v518_v43 }
 0x435   :  { %v520_v47 = vadd.f32 %v879_v41, %v519_v45 }
 0x437   :  { %v524_v49 = vsel %vm523_vm8, %v879_v41, %v520_v47 }
 0x438   :  { %v529_v50 = vsel %vm526_vm9, %v528_v48, %v524_v49 }
 0x439   :  { %v544_v51 = vmul.f32 %v877_v32, %v529_v50  ;;  %v591_v32 = vld [vmem:[#allocation7 + $0x8] sm:$0xf] }
 0x43a   :  { %v617_v52 = vpop.permute.xlu0 %616  ;;  %v596_v33 = vsel %vm226_vm2, %v591_v32, 0 }
 0x43b   :  { %v622_v53 = vsel %vm127_vm1, %v617_v52, 0  ;;  %v546_v54 = vpack.c.bf16 %v544_v51, %v544_v51  ;;  %605 = vmatpush.bf16.msrb.mxu2 %v596_v33 }
 0x43c   :  { %631 = vmatpush.bf16.xpose.msra.mxu3 %v622_v53 }
 0x43d   :  { %829 = vmatmul.msk.bf16.vlgmr.msrb.gmra.mxu0 %vm127_vm1, %v546_v54 }
 0x443   :  { %832 = vmatmul.msk.bf16.vlgmr.msra.gmra.mxu3 %vm127_vm1, %v615_v55 }
 0x44d   :  { %833 = vmatmul.msk.bf16.vlgmr.msra.gmra.mxu0 %vm127_vm1, %v638_v56 }
 0x465   :  { %v503_v57 = vpop.xlane.xlu0 %502 }
 0x466   :  { %v505_v58 = vsub.f32 %v494_v27, %v503_v57 }
 0x468   :  { %v508_v59 = vmul.f32 1.442695, %v505_v58 }
 0x46a   :  { %880 = vpow2.f32 %v508_v59 }
 0x470   :  { %v881_v60 = vpop.eup %880 }
 0x471   :  { %v513_v61 = vsel %vm127_vm1, %v881_v60, 0.0 }
 0x472   :  { %514 = vadd.xlane.f32.xlu2 %v513_v61 }
 0x4ba   :  { %v565_v0 = vpop.f32.mrf.mxu0 }
 0x4c2   :  { %v567_v1 = vpop.f32.mrf.mxu0 }
 0x4c6   :  { %v633_v3 = vpop.f32.mrf.mxu3 }
 0x4c7   :  { %v660_v4 = vsel %vm127_vm1, %v633_v3, -inf }
 0x4c8   :  { %661 = vmax.xlane.f32.xlu0 %v660_v4 }
 0x4ca   :  { %v656_v5 = vpop.f32.mrf.mxu0 }
 0x4cb   :  { %v663_v6 = vsel %vm127_vm1, %v656_v5, -inf }
 0x4cc   :  { %664 = vmax.xlane.f32.xlu1 %v663_v6 }
 0x4ce   :  { %v635_v63 = vpop.f32.mrf.mxu3 }
 0x4d2   :  { %v658_v7 = vpop.f32.mrf.mxu0 }
 0x4d3   :  { %v753_v7 = vld [vmem:[#allocation7 + $0xc] sm:$0xf] }
 0x4e5   :  { %v515_v8 = vpop.xlane.xlu2 %514 }
 0x4e6   :  { %882 = vrcp.f32 %v515_v8  ;;  %v541_v13 = vand.u32 2147483648, %v515_v8  ;;  %v539_v15 = vand.u32 2147483647, %v515_v8  ;;  %vm535_vm11 = vweird.f32 %v515_v8 }
 0x4e8   :  { %v542_v17 = vor.u32 1.1754944e-38, %v541_v13  ;;  %vm540_vm13 = vcmp.eq.f32.partialorder %v539_v15, 8.507059e+37 }
 0x4ec   :  { %v883_v9 = vpop.eup %882 }
 0x4ed   :  { %v531_v11 = vmul.f32 %v883_v9, %v515_v8  ;;  %vm536_vm10 = vweird.f32 %v883_v9  ;;  %v758_v8 = vsel %vm226_vm2, %v753_v7, 0 }
 0x4ee   :  { %vm537_vm12 = vmor %vm535_vm11, %vm536_vm10  ;;  %767 = vmatpush.bf16.msrb.mxu3 %v758_v8 }
 0x4ef   :  { %v532_v12 = vsub.f32 1.0, %v531_v11 }
 0x4f1   :  { %v533_v14 = vmul.f32 %v883_v9, %v532_v12 }
 0x4f3   :  { %v534_v16 = vadd.f32 %v883_v9, %v533_v14 }
 0x4f5   :  { %v538_v19 = vsel %vm537_vm12, %v883_v9, %v534_v16  ;;  %v859_v16 = vld [vmem:[%s1194_s4] ss:$0 sm:$0xff]  ;;  %s1010_s4 = smov 128  }
 0x4f6   :  { %v543_v2 = vsel %vm540_vm13, %v542_v17, %v538_v19 }
 0x4f7   :  { %v545_v20 = vmul.f32 %v881_v60, %v543_v2 }
 0x4f9   :  { %v547_v21 = vpack.c.bf16 %v545_v20, %v545_v20 }
 0x4fb   :  { %830 = vmatmul.msk.bf16.vlgmr.msrb.gmra.mxu1 %vm127_vm1, %v547_v21 }
 0x53b   :  { %v662_v22 = vpop.xlane.xlu0 %661 }
 0x53c   :  { %v666_v23 = vsub.f32 %v633_v3, %v662_v22 }
 0x53e   :  { %v668_v24 = vmul.f32 1.442695, %v666_v23 }
 0x53f   :  { %v665_v25 = vpop.xlane.xlu1 %664 }
 0x540   :  { %884 = vpow2.f32 %v668_v24  ;;  %v667_v26 = vsub.f32 %v656_v5, %v665_v25 }
 0x542   :  { %v670_v27 = vmul.f32 1.442695, %v667_v26 }
 0x544   :  { %886 = vpow2.f32 %v670_v27 }
 0x546   :  { %v885_v28 = vpop.eup %884 }
 0x547   :  { %v672_v29 = vsel %vm127_vm1, %v885_v28, 0.0 }
 0x548   :  { %673 = vadd.xlane.f32.xlu0 %v672_v29 }
 0x54a   :  { %v887_v30 = vpop.eup %886 }
 0x54b   :  { %v675_v31 = vsel %vm127_vm1, %v887_v30, 0.0 }
 0x54c   :  { %676 = vadd.xlane.f32.xlu2 %v675_v31 }
 0x55c   :  { %710 = vrot.lane.b32.xlu0 %v1061_v10, %s1008_s17 }
 0x564   :  { %731 = vrot.lane.b32.xlu2 %v1065_v18, %s1008_s17 }
 0x578   :  { %v586_v35 = vpop.f32.mrf.mxu1 }
 0x579   :  { %v590_v36 = vpack.c.bf16 %v586_v35, %v565_v0 }
 0x57b   :  { %831 = vmatmul.msk.bf16.vlgmr.msrb.gmra.mxu2 %vm127_vm1, %v590_v36 }
 0x580   :  { %v588_v37 = vpop.f32.mrf.mxu1 }
 0x5bb   :  { %v674_v39 = vpop.xlane.xlu0 %673 }
 0x5bc   :  { %888 = vrcp.f32 %v674_v39  ;;  %v687_v45 = vand.u32 2147483647, %v674_v39  ;;  %v689_v46 = vand.u32 2147483648, %v674_v39  ;;  %vm683_vm15 = vweird.f32 %v674_v39 }
 0x5be   :  { %vm688_vm4 = vcmp.eq.f32.partialorder %v687_v45, 8.507059e+37  ;;  %v690_v51 = vor.u32 1.1754944e-38, %v689_v46 }
 0x5bf   :  { %v677_v40 = vpop.xlane.xlu2 %676 }
 0x5c0   :  { %890 = vrcp.f32 %v677_v40  ;;  %v703_v52 = vand.u32 2147483648, %v677_v40  ;;  %v701_v55 = vand.u32 2147483647, %v677_v40  ;;  %vm697_vm6 = vweird.f32 %v677_v40 }
 0x5c2   :  { %v889_v41 = vpop.eup %888  ;;  %v704_v59 = vor.u32 1.1754944e-38, %v703_v52  ;;  %vm702_vm8 = vcmp.eq.f32.partialorder %v701_v55, 8.507059e+37 }
 0x5c3   :  { %v679_v42 = vmul.f32 %v889_v41, %v674_v39  ;;  %vm684_vm14 = vweird.f32 %v889_v41 }
 0x5c4   :  { %vm685_vm3 = vmor %vm683_vm15, %vm684_vm14 }
 0x5c5   :  { %v680_v43 = vsub.f32 1.0, %v679_v42 }
 0x5c6   :  { %v891_v44 = vpop.eup %890 }
 0x5c7   :  { %v681_v10 = vmul.f32 %v889_v41, %v680_v43  ;;  %v693_v18 = vmul.f32 %v891_v44, %v677_v40  ;;  %v732_v47 = vpop.permute.xlu2 %731  ;;  %vm698_vm5 = vweird.f32 %v891_v44 }
 0x5c8   :  { %v737_v48 = vsel %vm226_vm2, %v732_v47, 0  ;;  %vm699_vm7 = vmor %vm697_vm6, %vm698_vm5 }
 0x5c9   :  { %v682_v49 = vadd.f32 %v889_v41, %v681_v10  ;;  %v694_v50 = vsub.f32 1.0, %v693_v18  ;;  %746 = vmatpush.bf16.msra.mxu2 %v737_v48 }
 0x5cb   :  { %v686_v53 = vsel %vm685_vm3, %v889_v41, %v682_v49  ;;  %v695_v54 = vmul.f32 %v891_v44, %v694_v50 }
 0x5cc   :  { %v691_v56 = vsel %vm688_vm4, %v690_v51, %v686_v53 }
 0x5cd   :  { %v706_v57 = vmul.f32 %v885_v28, %v691_v56  ;;  %v696_v58 = vadd.f32 %v891_v44, %v695_v54 }
 0x5ce   :  { %v711_v60 = vpop.permute.xlu0 %710 }
 0x5cf   :  { %v700_v61 = vsel %vm699_vm7, %v891_v44, %v696_v58  ;;  %v716_v0 = vsel %vm226_vm2, %v711_v60, 0  ;;  %v708_v4 = vpack.c.bf16 %v706_v57, %v706_v57 }
 0x5d0   :  { %v705_v1 = vsel %vm702_vm8, %v704_v59, %v700_v61  ;;  %725 = vmatpush.bf16.msra.mxu1 %v716_v0 }
 0x5d1   :  { %v707_v3 = vmul.f32 %v887_v30, %v705_v1 }
 0x5d3   :  { %834 = vmatmul.msk.bf16.vlgmr.msra.gmra.mxu1 %vm127_vm1, %v708_v4  ;;  %v709_v5 = vpack.c.bf16 %v707_v3, %v707_v3 }
 0x5d5   :  { %835 = vmatmul.msk.bf16.vlgmr.msra.gmra.mxu2 %vm127_vm1, %v709_v5 }
 0x5fe   :  { %v607_v6 = vpop.f32.mrf.mxu2 }
 0x5ff   :  { %v612_v63 = vadd.f32 %v607_v6, %v1152_v38  ;;  %v450_v38 = vadd.f32 %v1170_v34, %v1160_v62 }
 0x606   :  { %v609_v9 = vpop.f32.mrf.mxu2 }
 0x607   :  { %v613_v20 = vadd.f32 %v609_v9, %v450_v38 }
 0x650   :  { %v727_v11 = vpop.f32.mrf.mxu1 }
 0x658   :  { %v729_v12 = vpop.f32.mrf.mxu1  ;;  %v748_v13 = vpop.f32.mrf.mxu2 }
 0x659   :  { %v752_v14 = vpack.c.bf16 %v748_v13, %v727_v11 }
 0x65b   :  { %836 = vmatmul.msk.bf16.vlgmr.msrb.gmra.mxu3 %vm127_vm1, %v752_v14 }
 0x660   :  { %v750_v15 = vpop.f32.mrf.mxu2 }
 0x6de   :  { %v769_v17 = vpop.f32.mrf.mxu3 }
 0x6df   :  { %v774_v19 = vadd.f32 %v769_v17, %v612_v63 }
 0x6e1   :  { %v780_v2 = vadd.f32 %v859_v16, %v774_v19 }
 0x6e3   :  { %782 = vst.msk [vmem:[#allocation8] sm:$0xff] %vm92_vm0, %v780_v2 }
 0x6e6   :  { %v771_v21 = vpop.f32.mrf.mxu3 }
 0x6e7   :  { %v775_v22 = vadd.f32 %v771_v21, %v613_v20 }
 0x6e9   :  { %v781_v23 = vadd.f32 %v859_v16, %v775_v22 }
 0x6eb   :  { %783 = vst.msk [vmem:[#allocation8 + $0x8] sm:$0xff] %vm92_vm0, %v781_v23 }
 0x6ec   :  { %796 = dma.vmem_to_hbm [thread:$0]  %s789_s21, 256, %s791_s24, [#allocation4], %s1010_s4, %s1010_s4, %s1011_s25  }
 0x6ed   :  { %992 = dma.done.wait [#allocation4], 256  }
 0x6ee   :  { %993 = vsyncadd [#allocation4], 4294967040 }
 0x6ef   :  { %801 = vsyncpa [#allocation3], 1 }
 0x6f0   :  { %802 = vsyncpa [#allocation6], 1 }
 0x6f1   :  { %803 = vsyncpa [#allocation4], 1 }

</bundles_post_ra>
